<compile_context>
chip_gen: v6e
topology: v6e:2x2x1
jax: 0.10.0
libtpu: 0.0.40
codegen_flags: <defaults>
</compile_context>

<pallas_src>
import jax
import jax.numpy as jnp
from jax.experimental import pallas as pl
from jax.experimental.pallas import tpu as pltpu


# ------------------------------- the wrapper --------------------------------

def _decoder_forward(params, keys_enc, values_enc, h_init, c_init, label, input_len):
    B, T_in, H = keys_enc.shape
    V = params['wp2'].shape[1]
    T_steps = label.shape[1] - 1

    B_pad = ((B + 7) // 8) * 8          # sublane-align batch
    V_pad = ((V + 127) // 128) * 128    # lane-align vocab
    BT = B_pad * T_in
    pad_b = B_pad - B
    NEG = -1e30

    # ---- one-time glue (fused into the surrounding jit, off the step path) --
    embed_seq = jnp.transpose(params['embed'][label[:, :T_steps]], (1, 0, 2))  # (T,B,H)

    def padb(x, axis):
        widths = [(0, 0)] * x.ndim
        widths[axis] = (0, pad_b)
        return jnp.pad(x, widths)

    embed_seq = padb(embed_seq, 1)                       # (T, B_pad, H)
    keys_p = padb(keys_enc, 0)                           # (B_pad, T_in, H)
    values_p = padb(values_enc, 0)                       # (B_pad, T_in, H)
    h_init_p = padb(h_init, 1)                           # (2, B_pad, H)
    c_init_p = padb(c_init, 1)                           # (2, B_pad, H)
    # Pad rows get full-length masks so the renormalization never divides by 0.
    input_len_p = jnp.concatenate(
        [input_len, jnp.full((pad_b,), T_in, dtype=input_len.dtype)])
    mask = (jnp.arange(T_in)[None, :] < input_len_p[:, None]).astype(jnp.float32)

    # Hoisted query projection onto the (static) encoder keys.
    keys_w = jnp.einsum('btg,hg->bth', keys_p, params['wq'])    # (B_pad, T_in, H)
    bk = jnp.einsum('btg,g->bt', keys_p, params['bq'][0])       # (B_pad, T_in)

    # Hoisted initial context: attention with h = h0 of the last LSTM cell.
    h0b = jnp.broadcast_to(params['h0_last'], (B_pad, H))
    s0 = jnp.einsum('bth,bh->bt', keys_w, h0b) + bk
    e0 = jnp.exp(s0 - jnp.max(s0, axis=1, keepdims=True)) * mask
    a0 = e0 / jnp.sum(e0, axis=1, keepdims=True)
    ctx_init = jnp.einsum('bt,bth->bh', a0, values_p)           # (B_pad, H)

    # Weight prep: K-fused LSTM weights; context halves folded into V_comb.
    w0x = params['w_ih0'][:H]                    # acts on the embedded token
    w0c = params['w_ih0'][H:]                    # acts on the attention context
    wp1h = params['wp1'][:H]
    wp1c = params['wp1'][H:]
    W0 = jnp.concatenate([w0x, params['w_hh0']], axis=0)              # (2H, 4H)
    W1 = jnp.concatenate([params['w_ih1'], params['w_hh1']], axis=0)  # (2H, 4H)
    wp2_pad = jnp.pad(params['wp2'], ((0, 0), (0, V_pad - V)))        # (H, V_pad)
    neg_bias = jnp.where(jnp.arange(V_pad) < V, 0.0, NEG
                         ).astype(jnp.float32)[None, :]               # (1, V_pad)

    # Flattened (block-diagonal) attention operands -> plain MXU matmuls.
    keysT_flat = keys_w.reshape(BT, H).T                              # (H, BT)
    values_flat = values_p.reshape(BT, H)                             # (BT, H)
    # ctx only enters linearly via w0c (next step's gate) and wp1c (projection):
    # precompute values@w0c | values@wp1c and never materialize ctx in-kernel.
    V_comb = jnp.concatenate([values_flat @ w0c, values_flat @ wp1c], axis=1)  # (BT, 5H)
    ctxg_init = ctx_init @ w0c                                        # (B_pad, 4H)

    blk = jnp.arange(B_pad)[:, None] == jnp.arange(B_pad)[None, :]    # (B_pad, B_pad)
    blk_rep = jnp.repeat(blk, T_in, axis=1)                           # (B_pad, BT)
    mask_bd = jnp.where(blk_rep, jnp.tile(mask, (1, B_pad)), 0.0)     # length & block mask
    bk_bd = jnp.where(blk_rep, jnp.tile(bk, (1, B_pad)), NEG)         # bias, -inf off-block

    # ------------------------------- kernel ---------------------------------
    def kernel(embed_ref, keysT_ref, vcomb_ref, maskbd_ref, bkbd_ref,
               h0_ref, c0_ref, h1_ref, c1_ref, ctxg_ref,
               w0_ref, b0_ref, w1_ref, b1_ref, p1h_ref, wp2_ref, negb_ref,
               out_ref):
        h0 = h0_ref[...]
        c0 = c0_ref[...]
        h1 = h1_ref[...]
        c1 = c1_ref[...]
        ctx_g = ctxg_ref[...]    # previous-step context, already mapped through w0c

        def lstm_gates(g, c):
            # Full-vreg nonlinearities: 2 EUP pushes per cell instead of 4.
            s = jax.nn.sigmoid(g)
            t = jnp.tanh(g)
            i = s[:, 0 * H:1 * H]
            f = s[:, 1 * H:2 * H]
            gg = t[:, 2 * H:3 * H]
            o = s[:, 3 * H:4 * H]
            c_new = f * c + i * gg
            return o * jnp.tanh(c_new), c_new

        # Fully-unrolled decode loop (static, small T_steps); recurrence carried
        # in vregs; weights/keys read at their use sites (no hoisted live set).
        for step in range(T_steps):
            x = embed_ref[step]                                       # (B_pad, H)
            # layer 0: K-fused [x | h0] @ [w0x; w0h]; ctx term precomputed.
            g0 = (jnp.dot(jnp.concatenate([x, h0], axis=1), w0_ref[...],
                          preferred_element_type=jnp.float32)
                  + ctx_g + b0_ref[...])
            h0, c0 = lstm_gates(g0, c0)
            # layer 1: K-fused [h0 | h1] @ [w_ih1; w_hh1].
            g1 = (jnp.dot(jnp.concatenate([h0, h1], axis=1), w1_ref[...],
                          preferred_element_type=jnp.float32)
                  + b1_ref[...])
            h1, c1 = lstm_gates(g1, c1)
            # attention: two plain MXU matmuls over flattened block-diag keys/values
            s = jnp.dot(h1, keysT_ref[...],
                        preferred_element_type=jnp.float32) + bkbd_ref[...]
            e = jnp.exp(s - jnp.max(s, axis=1, keepdims=True)) * maskbd_ref[...]
            # NOTE: exact divide kept (pl.reciprocal(approx=True) is ~2^-12
            # accurate, too loose for the 1e-4 tolerance of this test).
            attn = e / jnp.sum(e, axis=1, keepdims=True)
            cv = jnp.dot(attn, vcomb_ref[...], preferred_element_type=jnp.float32)
            ctx_g = cv[:, :4 * H]          # feeds next step's g0 (via linearity)
            ctx_p = cv[:, 4 * H:]          # feeds this step's projection
            p = jnp.tanh(jnp.dot(h1, p1h_ref[...],
                                 preferred_element_type=jnp.float32) + ctx_p)
            logits = jnp.dot(p, wp2_ref[...],
                             preferred_element_type=jnp.float32) + negb_ref[...]
            # log-softmax; pad lanes carry a -1e30 additive bias so they never win
            # the max and their exp underflows to 0 (no iota/select in the loop).
            m = jnp.max(logits, axis=1, keepdims=True)
            lse = m + jnp.log(jnp.sum(jnp.exp(logits - m), axis=1, keepdims=True))
            out_ref[:, step * V_pad:(step + 1) * V_pad] = logits - lse

    vmem = pl.BlockSpec(memory_space=pltpu.MemorySpace.VMEM)
    out = pl.pallas_call(
        kernel,
        out_shape=jax.ShapeDtypeStruct((B_pad, T_steps * V_pad), jnp.float32),
        in_specs=[vmem] * 17,
        out_specs=vmem,
    )(embed_seq, keysT_flat, V_comb, mask_bd, bk_bd,
      h_init_p[0], c_init_p[0], h_init_p[1], c_init_p[1], ctxg_init,
      W0, params['b0'], W1, params['b1'], wp1h, wp2_pad, neg_bias)

    # Final layout was produced in-kernel; only strip the alignment padding.
    return out.reshape(B_pad, T_steps, V_pad)[:B, :, :V]


# Jit the whole wrapper so the one-time glue compiles into a few fusions.
decoder_forward = jax.jit(_decoder_forward)


# --------------------------- pure-JAX reference -----------------------------

def reference_decoder(params, keys_enc, values_enc, h_init, c_init, label, input_len):
    B, T_in, H = keys_enc.shape
    T_steps = label.shape[1] - 1
    mask = (jnp.arange(T_in)[None, :] < input_len[:, None]).astype(jnp.float32)

    def attention(h):
        q = h @ params['wq'] + params['bq']
        scores = jnp.einsum('bth,bh->bt', keys_enc, q)
        attn = jax.nn.softmax(scores, axis=1)
        attn = attn * mask
        attn = attn / attn.sum(1, keepdims=True)
        return jnp.einsum('bt,bth->bh', attn, values_enc)

    def lstm(x, h, c, w_ih, w_hh, b):
        g = x @ w_ih + h @ w_hh + b
        i = jax.nn.sigmoid(g[:, :H]); f = jax.nn.sigmoid(g[:, H:2 * H])
        gg = jnp.tanh(g[:, 2 * H:3 * H]); o = jax.nn.sigmoid(g[:, 3 * H:])
        c2 = f * c + i * gg
        return o * jnp.tanh(c2), c2

    embed = params['embed'][label]
    hs = [h_init[0], h_init[1]]
    cs = [c_init[0], c_init[1]]
    ctx = attention(jnp.broadcast_to(params['h0_last'], (B, H)))
    outs = []
    for i in range(T_steps):
        x = jnp.concatenate([embed[:, i, :], ctx], axis=1)
        hs[0], cs[0] = lstm(x, hs[0], cs[0], params['w_ih0'], params['w_hh0'], params['b0'])
        hs[1], cs[1] = lstm(hs[0], hs[1], cs[1], params['w_ih1'], params['w_hh1'], params['b1'])
        h = hs[1]
        ctx = attention(h)
        hcat = jnp.concatenate([h, ctx], axis=1)
        p = jnp.tanh(hcat @ params['wp1'])
        logits = p @ params['wp2']
        outs.append(jax.nn.log_softmax(logits, axis=1))
    return jnp.stack(outs, axis=1)


# ---------------------------------- main ------------------------------------

if __name__ == "__main__":
    B, H, V = 2, 32, 40          # batch, hidden_dimension, output_size (vocab)
    T_in, T_lab = 8, 6           # encoder length, label length
    n_layers = 2

    key = jax.random.PRNGKey(0)
    ks = jax.random.split(key, 20)
    u = lambda k, shape, s=0.1: jax.random.uniform(k, shape, jnp.float32, -s, s)

    params = dict(
        embed=u(ks[0], (V, H), 0.3),          # xavier-uniform-ish embedding table
        w_ih0=u(ks[1], (2 * H, 4 * H)),       # MyLSTMCell(2H -> H): weight_ih^T
        w_hh0=u(ks[2], (H, 4 * H)),           # weight_hh^T
        b0=u(ks[3], (1, 4 * H)),              # b_ih + b_hh combined
        w_ih1=u(ks[4], (H, 4 * H)),           # MyLSTMCell(H -> H)
        w_hh1=u(ks[5], (H, 4 * H)),
        b1=u(ks[6], (1, 4 * H)),
        wq=u(ks[7], (H, H)),                  # self.linear
        bq=u(ks[8], (1, H)),
        wp1=u(ks[9], (2 * H, H)),             # projection_layer1 (no bias)
        wp2=u(ks[10], (H, V)),                # projection_layer2 (no bias)
        h0_last=u(ks[11], (1, H), 0.5),       # h0 param of the last LSTM cell
    )

    keys_enc = u(ks[12], (B, T_in, H), 0.5)
    values_enc = u(ks[13], (B, T_in, H), 0.5)
    h_init = u(ks[14], (n_layers, B, H), 0.5)     # last_hiddens[0]
    c_init = u(ks[15], (n_layers, B, H), 0.5)     # last_hiddens[1]
    label = jax.random.randint(ks[16], (B, T_lab), 0, V)
    input_len = jnp.array([T_in, T_in - 3], jnp.int32)

    out = jax.block_until_ready(
        decoder_forward(params, keys_enc, values_enc, h_init, c_init, label, input_len))
    ref = reference_decoder(params, keys_enc, values_enc, h_init, c_init, label, input_len)

    assert out.shape == (B, T_lab - 1, V), out.shape
    assert jnp.allclose(out, ref, atol=1e-4, rtol=1e-4), float(jnp.max(jnp.abs(out - ref)))
    print("KERNEL_OK")
</pallas_src>

<mosaic_0001>
module attributes {stable_mosaic.version = 11 : i64} {
  func.func @kernel(%arg0: memref<5x8x32xf32, #tpu.memory_space<vmem>>, %arg1: memref<32x64xf32, #tpu.memory_space<vmem>>, %arg2: memref<64x160xf32, #tpu.memory_space<vmem>>, %arg3: memref<8x64xf32, #tpu.memory_space<vmem>>, %arg4: memref<8x64xf32, #tpu.memory_space<vmem>>, %arg5: memref<8x32xf32, #tpu.memory_space<vmem>>, %arg6: memref<8x32xf32, #tpu.memory_space<vmem>>, %arg7: memref<8x32xf32, #tpu.memory_space<vmem>>, %arg8: memref<8x32xf32, #tpu.memory_space<vmem>>, %arg9: memref<8x128xf32, #tpu.memory_space<vmem>>, %arg10: memref<64x128xf32, #tpu.memory_space<vmem>>, %arg11: memref<1x128xf32, #tpu.memory_space<vmem>>, %arg12: memref<64x128xf32, #tpu.memory_space<vmem>>, %arg13: memref<1x128xf32, #tpu.memory_space<vmem>>, %arg14: memref<32x32xf32, #tpu.memory_space<vmem>>, %arg15: memref<32x128xf32, #tpu.memory_space<vmem>>, %arg16: memref<1x128xf32, #tpu.memory_space<vmem>>, %arg17: memref<8x640xf32, #tpu.memory_space<vmem>>) attributes {dimension_semantics = [], scalar_prefetch = 0 : i64, scratch_operands = 0 : i64, tpu.core_type = #tpu.core_type<tc>} {
    %c0 = arith.constant 0 : index
    %c0_0 = arith.constant 0 : index
    %0 = vector.load %arg5[%c0, %c0_0] : memref<8x32xf32, #tpu.memory_space<vmem>>, vector<8x32xf32>
    %c0_1 = arith.constant 0 : index
    %c0_2 = arith.constant 0 : index
    %1 = vector.load %arg6[%c0_1, %c0_2] : memref<8x32xf32, #tpu.memory_space<vmem>>, vector<8x32xf32>
    %c0_3 = arith.constant 0 : index
    %c0_4 = arith.constant 0 : index
    %2 = vector.load %arg7[%c0_3, %c0_4] : memref<8x32xf32, #tpu.memory_space<vmem>>, vector<8x32xf32>
    %c0_5 = arith.constant 0 : index
    %c0_6 = arith.constant 0 : index
    %3 = vector.load %arg8[%c0_5, %c0_6] : memref<8x32xf32, #tpu.memory_space<vmem>>, vector<8x32xf32>
    %c0_7 = arith.constant 0 : index
    %c0_8 = arith.constant 0 : index
    %4 = vector.load %arg9[%c0_7, %c0_8] : memref<8x128xf32, #tpu.memory_space<vmem>>, vector<8x128xf32>
    %c0_9 = arith.constant 0 : index
    %c0_10 = arith.constant 0 : index
    %c0_11 = arith.constant 0 : index
    %5 = vector.load %arg0[%c0_9, %c0_10, %c0_11] : memref<5x8x32xf32, #tpu.memory_space<vmem>>, vector<1x8x32xf32>
    %6 = vector.shape_cast %5 : vector<1x8x32xf32> to vector<8x32xf32>
    %7 = tpu.concatenate %6, %0 in 1 : vector<8x32xf32>, vector<8x32xf32> -> vector<8x64xf32>
    %c0_12 = arith.constant 0 : index
    %c0_13 = arith.constant 0 : index
    %8 = vector.load %arg10[%c0_12, %c0_13] : memref<64x128xf32, #tpu.memory_space<vmem>>, vector<64x128xf32>
    %cst = arith.constant dense<0.000000e+00> : vector<8x128xf32>
    %9 = tpu.matmul %7, %8, %cst {dimension_numbers = #tpu.dot_dimension_numbers<[1], [0], [0], [1], [0, 0, 1, 1], [], []>} : vector<8x64xf32>, vector<64x128xf32>, vector<8x128xf32> -> vector<8x128xf32>
    %10 = arith.addf %9, %4 : vector<8x128xf32>
    %c0_14 = arith.constant 0 : index
    %c0_15 = arith.constant 0 : index
    %11 = vector.load %arg11[%c0_14, %c0_15] : memref<1x128xf32, #tpu.memory_space<vmem>>, vector<1x128xf32>
    %12 = vector.broadcast %11 : vector<1x128xf32> to vector<8x128xf32>
    %13 = arith.addf %10, %12 : vector<8x128xf32>
    %14 = arith.negf %13 : vector<8x128xf32>
    %15 = math.exp %14 : vector<8x128xf32>
    %cst_16 = arith.constant 1.000000e+00 : f32
    %16 = vector.broadcast %cst_16 : f32 to vector<8x128xf32>
    %17 = arith.addf %16, %15 : vector<8x128xf32>
    %18 = arith.divf %16, %17 : vector<8x128xf32>
    %19 = math.tanh %13 : vector<8x128xf32>
    %20 = vector.extract_strided_slice %18 {offsets = [0, 0], sizes = [8, 32], strides = [1, 1]} : vector<8x128xf32> to vector<8x32xf32>
    %21 = vector.extract_strided_slice %18 {offsets = [0, 32], sizes = [8, 32], strides = [1, 1]} : vector<8x128xf32> to vector<8x32xf32>
    %22 = vector.extract_strided_slice %19 {offsets = [0, 64], sizes = [8, 32], strides = [1, 1]} : vector<8x128xf32> to vector<8x32xf32>
    %23 = vector.extract_strided_slice %18 {offsets = [0, 96], sizes = [8, 32], strides = [1, 1]} : vector<8x128xf32> to vector<8x32xf32>
    %24 = arith.mulf %21, %1 : vector<8x32xf32>
    %25 = arith.mulf %20, %22 : vector<8x32xf32>
    %26 = arith.addf %24, %25 : vector<8x32xf32>
    %27 = math.tanh %26 : vector<8x32xf32>
    %28 = arith.mulf %23, %27 : vector<8x32xf32>
    %29 = tpu.concatenate %28, %2 in 1 : vector<8x32xf32>, vector<8x32xf32> -> vector<8x64xf32>
    %c0_17 = arith.constant 0 : index
    %c0_18 = arith.constant 0 : index
    %30 = vector.load %arg12[%c0_17, %c0_18] : memref<64x128xf32, #tpu.memory_space<vmem>>, vector<64x128xf32>
    %cst_19 = arith.constant dense<0.000000e+00> : vector<8x128xf32>
    %31 = tpu.matmul %29, %30, %cst_19 {dimension_numbers = #tpu.dot_dimension_numbers<[1], [0], [0], [1], [0, 0, 1, 1], [], []>} : vector<8x64xf32>, vector<64x128xf32>, vector<8x128xf32> -> vector<8x128xf32>
    %c0_20 = arith.constant 0 : index
    %c0_21 = arith.constant 0 : index
    %32 = vector.load %arg13[%c0_20, %c0_21] : memref<1x128xf32, #tpu.memory_space<vmem>>, vector<1x128xf32>
    %33 = vector.broadcast %32 : vector<1x128xf32> to vector<8x128xf32>
    %34 = arith.addf %31, %33 : vector<8x128xf32>
    %35 = arith.negf %34 : vector<8x128xf32>
    %36 = math.exp %35 : vector<8x128xf32>
    %cst_22 = arith.constant 1.000000e+00 : f32
    %37 = vector.broadcast %cst_22 : f32 to vector<8x128xf32>
    %38 = arith.addf %37, %36 : vector<8x128xf32>
    %39 = arith.divf %37, %38 : vector<8x128xf32>
    %40 = math.tanh %34 : vector<8x128xf32>
    %41 = vector.extract_strided_slice %39 {offsets = [0, 0], sizes = [8, 32], strides = [1, 1]} : vector<8x128xf32> to vector<8x32xf32>
    %42 = vector.extract_strided_slice %39 {offsets = [0, 32], sizes = [8, 32], strides = [1, 1]} : vector<8x128xf32> to vector<8x32xf32>
    %43 = vector.extract_strided_slice %40 {offsets = [0, 64], sizes = [8, 32], strides = [1, 1]} : vector<8x128xf32> to vector<8x32xf32>
    %44 = vector.extract_strided_slice %39 {offsets = [0, 96], sizes = [8, 32], strides = [1, 1]} : vector<8x128xf32> to vector<8x32xf32>
    %45 = arith.mulf %42, %3 : vector<8x32xf32>
    %46 = arith.mulf %41, %43 : vector<8x32xf32>
    %47 = arith.addf %45, %46 : vector<8x32xf32>
    %48 = math.tanh %47 : vector<8x32xf32>
    %49 = arith.mulf %44, %48 : vector<8x32xf32>
    %c0_23 = arith.constant 0 : index
    %c0_24 = arith.constant 0 : index
    %50 = vector.load %arg1[%c0_23, %c0_24] : memref<32x64xf32, #tpu.memory_space<vmem>>, vector<32x64xf32>
    %cst_25 = arith.constant dense<0.000000e+00> : vector<8x64xf32>
    %51 = tpu.matmul %49, %50, %cst_25 {dimension_numbers = #tpu.dot_dimension_numbers<[1], [0], [0], [1], [0, 0, 1, 1], [], []>} : vector<8x32xf32>, vector<32x64xf32>, vector<8x64xf32> -> vector<8x64xf32>
    %c0_26 = arith.constant 0 : index
    %c0_27 = arith.constant 0 : index
    %52 = vector.load %arg4[%c0_26, %c0_27] : memref<8x64xf32, #tpu.memory_space<vmem>>, vector<8x64xf32>
    %53 = arith.addf %51, %52 : vector<8x64xf32>
    %cst_28 = arith.constant dense<0xFF800000> : vector<8xf32>
    %54 = vector.multi_reduction <maximumf>, %53, %cst_28 [1] : vector<8x64xf32> to vector<8xf32>
    %55 = vector.shape_cast %54 : vector<8xf32> to vector<8x1xf32>
    %56 = vector.broadcast %55 : vector<8x1xf32> to vector<8x64xf32>
    %57 = arith.subf %53, %56 : vector<8x64xf32>
    %58 = math.exp %57 : vector<8x64xf32>
    %c0_29 = arith.constant 0 : index
    %c0_30 = arith.constant 0 : index
    %59 = vector.load %arg3[%c0_29, %c0_30] : memref<8x64xf32, #tpu.memory_space<vmem>>, vector<8x64xf32>
    %60 = arith.mulf %58, %59 : vector<8x64xf32>
    %cst_31 = arith.constant dense<0.000000e+00> : vector<8xf32>
    %61 = vector.multi_reduction <add>, %60, %cst_31 [1] : vector<8x64xf32> to vector<8xf32>
    %62 = vector.shape_cast %61 : vector<8xf32> to vector<8x1xf32>
    %63 = vector.broadcast %62 : vector<8x1xf32> to vector<8x64xf32>
    %64 = arith.divf %60, %63 : vector<8x64xf32>
    %c0_32 = arith.constant 0 : index
    %c0_33 = arith.constant 0 : index
    %65 = vector.load %arg2[%c0_32, %c0_33] : memref<64x160xf32, #tpu.memory_space<vmem>>, vector<64x160xf32>
    %cst_34 = arith.constant dense<0.000000e+00> : vector<8x160xf32>
    %66 = tpu.matmul %64, %65, %cst_34 {dimension_numbers = #tpu.dot_dimension_numbers<[1], [0], [0], [1], [0, 0, 1, 1], [], []>} : vector<8x64xf32>, vector<64x160xf32>, vector<8x160xf32> -> vector<8x160xf32>
    %67 = vector.extract_strided_slice %66 {offsets = [0, 0], sizes = [8, 128], strides = [1, 1]} : vector<8x160xf32> to vector<8x128xf32>
    %68 = vector.extract_strided_slice %66 {offsets = [0, 128], sizes = [8, 32], strides = [1, 1]} : vector<8x160xf32> to vector<8x32xf32>
    %c0_35 = arith.constant 0 : index
    %c0_36 = arith.constant 0 : index
    %69 = vector.load %arg14[%c0_35, %c0_36] : memref<32x32xf32, #tpu.memory_space<vmem>>, vector<32x32xf32>
    %cst_37 = arith.constant dense<0.000000e+00> : vector<8x32xf32>
    %70 = tpu.matmul %49, %69, %cst_37 {dimension_numbers = #tpu.dot_dimension_numbers<[1], [0], [0], [1], [0, 0, 1, 1], [], []>} : vector<8x32xf32>, vector<32x32xf32>, vector<8x32xf32> -> vector<8x32xf32>
    %71 = arith.addf %70, %68 : vector<8x32xf32>
    %72 = math.tanh %71 : vector<8x32xf32>
    %c0_38 = arith.constant 0 : index
    %c0_39 = arith.constant 0 : index
    %73 = vector.load %arg15[%c0_38, %c0_39] : memref<32x128xf32, #tpu.memory_space<vmem>>, vector<32x128xf32>
    %cst_40 = arith.constant dense<0.000000e+00> : vector<8x128xf32>
    %74 = tpu.matmul %72, %73, %cst_40 {dimension_numbers = #tpu.dot_dimension_numbers<[1], [0], [0], [1], [0, 0, 1, 1], [], []>} : vector<8x32xf32>, vector<32x128xf32>, vector<8x128xf32> -> vector<8x128xf32>
    %c0_41 = arith.constant 0 : index
    %c0_42 = arith.constant 0 : index
    %75 = vector.load %arg16[%c0_41, %c0_42] : memref<1x128xf32, #tpu.memory_space<vmem>>, vector<1x128xf32>
    %76 = vector.broadcast %75 : vector<1x128xf32> to vector<8x128xf32>
    %77 = arith.addf %74, %76 : vector<8x128xf32>
    %cst_43 = arith.constant dense<0xFF800000> : vector<8xf32>
    %78 = vector.multi_reduction <maximumf>, %77, %cst_43 [1] : vector<8x128xf32> to vector<8xf32>
    %79 = vector.shape_cast %78 : vector<8xf32> to vector<8x1xf32>
    %80 = vector.broadcast %79 : vector<8x1xf32> to vector<8x128xf32>
    %81 = arith.subf %77, %80 : vector<8x128xf32>
    %82 = math.exp %81 : vector<8x128xf32>
    %cst_44 = arith.constant dense<0.000000e+00> : vector<8xf32>
    %83 = vector.multi_reduction <add>, %82, %cst_44 [1] : vector<8x128xf32> to vector<8xf32>
    %84 = vector.shape_cast %83 : vector<8xf32> to vector<8x1xf32>
    %85 = math.log %84 : vector<8x1xf32>
    %86 = arith.addf %79, %85 : vector<8x1xf32>
    %87 = vector.broadcast %86 : vector<8x1xf32> to vector<8x128xf32>
    %88 = arith.subf %77, %87 : vector<8x128xf32>
    %c0_45 = arith.constant 0 : index
    %c0_46 = arith.constant 0 : index
    %89 = vector.load %arg17[%c0_45, %c0_46] : memref<8x640xf32, #tpu.memory_space<vmem>>, vector<8x128xf32>
    tpu.vector_store %arg17[%c0_45, %c0_46], %88 {strides = array<i32>} : memref<8x640xf32, #tpu.memory_space<vmem>>, vector<8x128xf32>,
    %c1 = arith.constant 1 : index
    %c0_47 = arith.constant 0 : index
    %c0_48 = arith.constant 0 : index
    %90 = vector.load %arg0[%c1, %c0_47, %c0_48] : memref<5x8x32xf32, #tpu.memory_space<vmem>>, vector<1x8x32xf32>
    %91 = vector.shape_cast %90 : vector<1x8x32xf32> to vector<8x32xf32>
    %92 = tpu.concatenate %91, %28 in 1 : vector<8x32xf32>, vector<8x32xf32> -> vector<8x64xf32>
    %c0_49 = arith.constant 0 : index
    %c0_50 = arith.constant 0 : index
    %93 = vector.load %arg10[%c0_49, %c0_50] : memref<64x128xf32, #tpu.memory_space<vmem>>, vector<64x128xf32>
    %cst_51 = arith.constant dense<0.000000e+00> : vector<8x128xf32>
    %94 = tpu.matmul %92, %93, %cst_51 {dimension_numbers = #tpu.dot_dimension_numbers<[1], [0], [0], [1], [0, 0, 1, 1], [], []>} : vector<8x64xf32>, vector<64x128xf32>, vector<8x128xf32> -> vector<8x128xf32>
    %95 = arith.addf %94, %67 : vector<8x128xf32>
    %c0_52 = arith.constant 0 : index
    %c0_53 = arith.constant 0 : index
    %96 = vector.load %arg11[%c0_52, %c0_53] : memref<1x128xf32, #tpu.memory_space<vmem>>, vector<1x128xf32>
    %97 = vector.broadcast %96 : vector<1x128xf32> to vector<8x128xf32>
    %98 = arith.addf %95, %97 : vector<8x128xf32>
    %99 = arith.negf %98 : vector<8x128xf32>
    %100 = math.exp %99 : vector<8x128xf32>
    %cst_54 = arith.constant 1.000000e+00 : f32
    %101 = vector.broadcast %cst_54 : f32 to vector<8x128xf32>
    %102 = arith.addf %101, %100 : vector<8x128xf32>
    %103 = arith.divf %101, %102 : vector<8x128xf32>
    %104 = math.tanh %98 : vector<8x128xf32>
    %105 = vector.extract_strided_slice %103 {offsets = [0, 0], sizes = [8, 32], strides = [1, 1]} : vector<8x128xf32> to vector<8x32xf32>
    %106 = vector.extract_strided_slice %103 {offsets = [0, 32], sizes = [8, 32], strides = [1, 1]} : vector<8x128xf32> to vector<8x32xf32>
    %107 = vector.extract_strided_slice %104 {offsets = [0, 64], sizes = [8, 32], strides = [1, 1]} : vector<8x128xf32> to vector<8x32xf32>
    %108 = vector.extract_strided_slice %103 {offsets = [0, 96], sizes = [8, 32], strides = [1, 1]} : vector<8x128xf32> to vector<8x32xf32>
    %109 = arith.mulf %106, %26 : vector<8x32xf32>
    %110 = arith.mulf %105, %107 : vector<8x32xf32>
    %111 = arith.addf %109, %110 : vector<8x32xf32>
    %112 = math.tanh %111 : vector<8x32xf32>
    %113 = arith.mulf %108, %112 : vector<8x32xf32>
    %114 = tpu.concatenate %113, %49 in 1 : vector<8x32xf32>, vector<8x32xf32> -> vector<8x64xf32>
    %c0_55 = arith.constant 0 : index
    %c0_56 = arith.constant 0 : index
    %115 = vector.load %arg12[%c0_55, %c0_56] : memref<64x128xf32, #tpu.memory_space<vmem>>, vector<64x128xf32>
    %cst_57 = arith.constant dense<0.000000e+00> : vector<8x128xf32>
    %116 = tpu.matmul %114, %115, %cst_57 {dimension_numbers = #tpu.dot_dimension_numbers<[1], [0], [0], [1], [0, 0, 1, 1], [], []>} : vector<8x64xf32>, vector<64x128xf32>, vector<8x128xf32> -> vector<8x128xf32>
    %c0_58 = arith.constant 0 : index
    %c0_59 = arith.constant 0 : index
    %117 = vector.load %arg13[%c0_58, %c0_59] : memref<1x128xf32, #tpu.memory_space<vmem>>, vector<1x128xf32>
    %118 = vector.broadcast %117 : vector<1x128xf32> to vector<8x128xf32>
    %119 = arith.addf %116, %118 : vector<8x128xf32>
    %120 = arith.negf %119 : vector<8x128xf32>
    %121 = math.exp %120 : vector<8x128xf32>
    %cst_60 = arith.constant 1.000000e+00 : f32
    %122 = vector.broadcast %cst_60 : f32 to vector<8x128xf32>
    %123 = arith.addf %122, %121 : vector<8x128xf32>
    %124 = arith.divf %122, %123 : vector<8x128xf32>
    %125 = math.tanh %119 : vector<8x128xf32>
    %126 = vector.extract_strided_slice %124 {offsets = [0, 0], sizes = [8, 32], strides = [1, 1]} : vector<8x128xf32> to vector<8x32xf32>
    %127 = vector.extract_strided_slice %124 {offsets = [0, 32], sizes = [8, 32], strides = [1, 1]} : vector<8x128xf32> to vector<8x32xf32>
    %128 = vector.extract_strided_slice %125 {offsets = [0, 64], sizes = [8, 32], strides = [1, 1]} : vector<8x128xf32> to vector<8x32xf32>
    %129 = vector.extract_strided_slice %124 {offsets = [0, 96], sizes = [8, 32], strides = [1, 1]} : vector<8x128xf32> to vector<8x32xf32>
    %130 = arith.mulf %127, %47 : vector<8x32xf32>
    %131 = arith.mulf %126, %128 : vector<8x32xf32>
    %132 = arith.addf %130, %131 : vector<8x32xf32>
    %133 = math.tanh %132 : vector<8x32xf32>
    %134 = arith.mulf %129, %133 : vector<8x32xf32>
    %c0_61 = arith.constant 0 : index
    %c0_62 = arith.constant 0 : index
    %135 = vector.load %arg1[%c0_61, %c0_62] : memref<32x64xf32, #tpu.memory_space<vmem>>, vector<32x64xf32>
    %cst_63 = arith.constant dense<0.000000e+00> : vector<8x64xf32>
    %136 = tpu.matmul %134, %135, %cst_63 {dimension_numbers = #tpu.dot_dimension_numbers<[1], [0], [0], [1], [0, 0, 1, 1], [], []>} : vector<8x32xf32>, vector<32x64xf32>, vector<8x64xf32> -> vector<8x64xf32>
    %c0_64 = arith.constant 0 : index
    %c0_65 = arith.constant 0 : index
    %137 = vector.load %arg4[%c0_64, %c0_65] : memref<8x64xf32, #tpu.memory_space<vmem>>, vector<8x64xf32>
    %138 = arith.addf %136, %137 : vector<8x64xf32>
    %cst_66 = arith.constant dense<0xFF800000> : vector<8xf32>
    %139 = vector.multi_reduction <maximumf>, %138, %cst_66 [1] : vector<8x64xf32> to vector<8xf32>
    %140 = vector.shape_cast %139 : vector<8xf32> to vector<8x1xf32>
    %141 = vector.broadcast %140 : vector<8x1xf32> to vector<8x64xf32>
    %142 = arith.subf %138, %141 : vector<8x64xf32>
    %143 = math.exp %142 : vector<8x64xf32>
    %c0_67 = arith.constant 0 : index
    %c0_68 = arith.constant 0 : index
    %144 = vector.load %arg3[%c0_67, %c0_68] : memref<8x64xf32, #tpu.memory_space<vmem>>, vector<8x64xf32>
    %145 = arith.mulf %143, %144 : vector<8x64xf32>
    %cst_69 = arith.constant dense<0.000000e+00> : vector<8xf32>
    %146 = vector.multi_reduction <add>, %145, %cst_69 [1] : vector<8x64xf32> to vector<8xf32>
    %147 = vector.shape_cast %146 : vector<8xf32> to vector<8x1xf32>
    %148 = vector.broadcast %147 : vector<8x1xf32> to vector<8x64xf32>
    %149 = arith.divf %145, %148 : vector<8x64xf32>
    %c0_70 = arith.constant 0 : index
    %c0_71 = arith.constant 0 : index
    %150 = vector.load %arg2[%c0_70, %c0_71] : memref<64x160xf32, #tpu.memory_space<vmem>>, vector<64x160xf32>
    %cst_72 = arith.constant dense<0.000000e+00> : vector<8x160xf32>
    %151 = tpu.matmul %149, %150, %cst_72 {dimension_numbers = #tpu.dot_dimension_numbers<[1], [0], [0], [1], [0, 0, 1, 1], [], []>} : vector<8x64xf32>, vector<64x160xf32>, vector<8x160xf32> -> vector<8x160xf32>
    %152 = vector.extract_strided_slice %151 {offsets = [0, 0], sizes = [8, 128], strides = [1, 1]} : vector<8x160xf32> to vector<8x128xf32>
    %153 = vector.extract_strided_slice %151 {offsets = [0, 128], sizes = [8, 32], strides = [1, 1]} : vector<8x160xf32> to vector<8x32xf32>
    %c0_73 = arith.constant 0 : index
    %c0_74 = arith.constant 0 : index
    %154 = vector.load %arg14[%c0_73, %c0_74] : memref<32x32xf32, #tpu.memory_space<vmem>>, vector<32x32xf32>
    %cst_75 = arith.constant dense<0.000000e+00> : vector<8x32xf32>
    %155 = tpu.matmul %134, %154, %cst_75 {dimension_numbers = #tpu.dot_dimension_numbers<[1], [0], [0], [1], [0, 0, 1, 1], [], []>} : vector<8x32xf32>, vector<32x32xf32>, vector<8x32xf32> -> vector<8x32xf32>
    %156 = arith.addf %155, %153 : vector<8x32xf32>
    %157 = math.tanh %156 : vector<8x32xf32>
    %c0_76 = arith.constant 0 : index
    %c0_77 = arith.constant 0 : index
    %158 = vector.load %arg15[%c0_76, %c0_77] : memref<32x128xf32, #tpu.memory_space<vmem>>, vector<32x128xf32>
    %cst_78 = arith.constant dense<0.000000e+00> : vector<8x128xf32>
    %159 = tpu.matmul %157, %158, %cst_78 {dimension_numbers = #tpu.dot_dimension_numbers<[1], [0], [0], [1], [0, 0, 1, 1], [], []>} : vector<8x32xf32>, vector<32x128xf32>, vector<8x128xf32> -> vector<8x128xf32>
    %c0_79 = arith.constant 0 : index
    %c0_80 = arith.constant 0 : index
    %160 = vector.load %arg16[%c0_79, %c0_80] : memref<1x128xf32, #tpu.memory_space<vmem>>, vector<1x128xf32>
    %161 = vector.broadcast %160 : vector<1x128xf32> to vector<8x128xf32>
    %162 = arith.addf %159, %161 : vector<8x128xf32>
    %cst_81 = arith.constant dense<0xFF800000> : vector<8xf32>
    %163 = vector.multi_reduction <maximumf>, %162, %cst_81 [1] : vector<8x128xf32> to vector<8xf32>
    %164 = vector.shape_cast %163 : vector<8xf32> to vector<8x1xf32>
    %165 = vector.broadcast %164 : vector<8x1xf32> to vector<8x128xf32>
    %166 = arith.subf %162, %165 : vector<8x128xf32>
    %167 = math.exp %166 : vector<8x128xf32>
    %cst_82 = arith.constant dense<0.000000e+00> : vector<8xf32>
    %168 = vector.multi_reduction <add>, %167, %cst_82 [1] : vector<8x128xf32> to vector<8xf32>
    %169 = vector.shape_cast %168 : vector<8xf32> to vector<8x1xf32>
    %170 = math.log %169 : vector<8x1xf32>
    %171 = arith.addf %164, %170 : vector<8x1xf32>
    %172 = vector.broadcast %171 : vector<8x1xf32> to vector<8x128xf32>
    %173 = arith.subf %162, %172 : vector<8x128xf32>
    %c0_83 = arith.constant 0 : index
    %c128 = arith.constant 128 : index
    %174 = vector.load %arg17[%c0_83, %c128] : memref<8x640xf32, #tpu.memory_space<vmem>>, vector<8x128xf32>
    tpu.vector_store %arg17[%c0_83, %c128], %173 {strides = array<i32>} : memref<8x640xf32, #tpu.memory_space<vmem>>, vector<8x128xf32>,
    %c2 = arith.constant 2 : index
    %c0_84 = arith.constant 0 : index
    %c0_85 = arith.constant 0 : index
    %175 = vector.load %arg0[%c2, %c0_84, %c0_85] : memref<5x8x32xf32, #tpu.memory_space<vmem>>, vector<1x8x32xf32>
    %176 = vector.shape_cast %175 : vector<1x8x32xf32> to vector<8x32xf32>
    %177 = tpu.concatenate %176, %113 in 1 : vector<8x32xf32>, vector<8x32xf32> -> vector<8x64xf32>
    %c0_86 = arith.constant 0 : index
    %c0_87 = arith.constant 0 : index
    %178 = vector.load %arg10[%c0_86, %c0_87] : memref<64x128xf32, #tpu.memory_space<vmem>>, vector<64x128xf32>
    %cst_88 = arith.constant dense<0.000000e+00> : vector<8x128xf32>
    %179 = tpu.matmul %177, %178, %cst_88 {dimension_numbers = #tpu.dot_dimension_numbers<[1], [0], [0], [1], [0, 0, 1, 1], [], []>} : vector<8x64xf32>, vector<64x128xf32>, vector<8x128xf32> -> vector<8x128xf32>
    %180 = arith.addf %179, %152 : vector<8x128xf32>
    %c0_89 = arith.constant 0 : index
    %c0_90 = arith.constant 0 : index
    %181 = vector.load %arg11[%c0_89, %c0_90] : memref<1x128xf32, #tpu.memory_space<vmem>>, vector<1x128xf32>
    %182 = vector.broadcast %181 : vector<1x128xf32> to vector<8x128xf32>
    %183 = arith.addf %180, %182 : vector<8x128xf32>
    %184 = arith.negf %183 : vector<8x128xf32>
    %185 = math.exp %184 : vector<8x128xf32>
    %cst_91 = arith.constant 1.000000e+00 : f32
    %186 = vector.broadcast %cst_91 : f32 to vector<8x128xf32>
    %187 = arith.addf %186, %185 : vector<8x128xf32>
    %188 = arith.divf %186, %187 : vector<8x128xf32>
    %189 = math.tanh %183 : vector<8x128xf32>
    %190 = vector.extract_strided_slice %188 {offsets = [0, 0], sizes = [8, 32], strides = [1, 1]} : vector<8x128xf32> to vector<8x32xf32>
    %191 = vector.extract_strided_slice %188 {offsets = [0, 32], sizes = [8, 32], strides = [1, 1]} : vector<8x128xf32> to vector<8x32xf32>
    %192 = vector.extract_strided_slice %189 {offsets = [0, 64], sizes = [8, 32], strides = [1, 1]} : vector<8x128xf32> to vector<8x32xf32>
    %193 = vector.extract_strided_slice %188 {offsets = [0, 96], sizes = [8, 32], strides = [1, 1]} : vector<8x128xf32> to vector<8x32xf32>
    %194 = arith.mulf %191, %111 : vector<8x32xf32>
    %195 = arith.mulf %190, %192 : vector<8x32xf32>
    %196 = arith.addf %194, %195 : vector<8x32xf32>
    %197 = math.tanh %196 : vector<8x32xf32>
    %198 = arith.mulf %193, %197 : vector<8x32xf32>
    %199 = tpu.concatenate %198, %134 in 1 : vector<8x32xf32>, vector<8x32xf32> -> vector<8x64xf32>
    %c0_92 = arith.constant 0 : index
    %c0_93 = arith.constant 0 : index
    %200 = vector.load %arg12[%c0_92, %c0_93] : memref<64x128xf32, #tpu.memory_space<vmem>>, vector<64x128xf32>
    %cst_94 = arith.constant dense<0.000000e+00> : vector<8x128xf32>
    %201 = tpu.matmul %199, %200, %cst_94 {dimension_numbers = #tpu.dot_dimension_numbers<[1], [0], [0], [1], [0, 0, 1, 1], [], []>} : vector<8x64xf32>, vector<64x128xf32>, vector<8x128xf32> -> vector<8x128xf32>
    %c0_95 = arith.constant 0 : index
    %c0_96 = arith.constant 0 : index
    %202 = vector.load %arg13[%c0_95, %c0_96] : memref<1x128xf32, #tpu.memory_space<vmem>>, vector<1x128xf32>
    %203 = vector.broadcast %202 : vector<1x128xf32> to vector<8x128xf32>
    %204 = arith.addf %201, %203 : vector<8x128xf32>
    %205 = arith.negf %204 : vector<8x128xf32>
    %206 = math.exp %205 : vector<8x128xf32>
    %cst_97 = arith.constant 1.000000e+00 : f32
    %207 = vector.broadcast %cst_97 : f32 to vector<8x128xf32>
    %208 = arith.addf %207, %206 : vector<8x128xf32>
    %209 = arith.divf %207, %208 : vector<8x128xf32>
    %210 = math.tanh %204 : vector<8x128xf32>
    %211 = vector.extract_strided_slice %209 {offsets = [0, 0], sizes = [8, 32], strides = [1, 1]} : vector<8x128xf32> to vector<8x32xf32>
    %212 = vector.extract_strided_slice %209 {offsets = [0, 32], sizes = [8, 32], strides = [1, 1]} : vector<8x128xf32> to vector<8x32xf32>
    %213 = vector.extract_strided_slice %210 {offsets = [0, 64], sizes = [8, 32], strides = [1, 1]} : vector<8x128xf32> to vector<8x32xf32>
    %214 = vector.extract_strided_slice %209 {offsets = [0, 96], sizes = [8, 32], strides = [1, 1]} : vector<8x128xf32> to vector<8x32xf32>
    %215 = arith.mulf %212, %132 : vector<8x32xf32>
    %216 = arith.mulf %211, %213 : vector<8x32xf32>
    %217 = arith.addf %215, %216 : vector<8x32xf32>
    %218 = math.tanh %217 : vector<8x32xf32>
    %219 = arith.mulf %214, %218 : vector<8x32xf32>
    %c0_98 = arith.constant 0 : index
    %c0_99 = arith.constant 0 : index
    %220 = vector.load %arg1[%c0_98, %c0_99] : memref<32x64xf32, #tpu.memory_space<vmem>>, vector<32x64xf32>
    %cst_100 = arith.constant dense<0.000000e+00> : vector<8x64xf32>
    %221 = tpu.matmul %219, %220, %cst_100 {dimension_numbers = #tpu.dot_dimension_numbers<[1], [0], [0], [1], [0, 0, 1, 1], [], []>} : vector<8x32xf32>, vector<32x64xf32>, vector<8x64xf32> -> vector<8x64xf32>
    %c0_101 = arith.constant 0 : index
    %c0_102 = arith.constant 0 : index
    %222 = vector.load %arg4[%c0_101, %c0_102] : memref<8x64xf32, #tpu.memory_space<vmem>>, vector<8x64xf32>
    %223 = arith.addf %221, %222 : vector<8x64xf32>
    %cst_103 = arith.constant dense<0xFF800000> : vector<8xf32>
    %224 = vector.multi_reduction <maximumf>, %223, %cst_103 [1] : vector<8x64xf32> to vector<8xf32>
    %225 = vector.shape_cast %224 : vector<8xf32> to vector<8x1xf32>
    %226 = vector.broadcast %225 : vector<8x1xf32> to vector<8x64xf32>
    %227 = arith.subf %223, %226 : vector<8x64xf32>
    %228 = math.exp %227 : vector<8x64xf32>
    %c0_104 = arith.constant 0 : index
    %c0_105 = arith.constant 0 : index
    %229 = vector.load %arg3[%c0_104, %c0_105] : memref<8x64xf32, #tpu.memory_space<vmem>>, vector<8x64xf32>
    %230 = arith.mulf %228, %229 : vector<8x64xf32>
    %cst_106 = arith.constant dense<0.000000e+00> : vector<8xf32>
    %231 = vector.multi_reduction <add>, %230, %cst_106 [1] : vector<8x64xf32> to vector<8xf32>
    %232 = vector.shape_cast %231 : vector<8xf32> to vector<8x1xf32>
    %233 = vector.broadcast %232 : vector<8x1xf32> to vector<8x64xf32>
    %234 = arith.divf %230, %233 : vector<8x64xf32>
    %c0_107 = arith.constant 0 : index
    %c0_108 = arith.constant 0 : index
    %235 = vector.load %arg2[%c0_107, %c0_108] : memref<64x160xf32, #tpu.memory_space<vmem>>, vector<64x160xf32>
    %cst_109 = arith.constant dense<0.000000e+00> : vector<8x160xf32>
    %236 = tpu.matmul %234, %235, %cst_109 {dimension_numbers = #tpu.dot_dimension_numbers<[1], [0], [0], [1], [0, 0, 1, 1], [], []>} : vector<8x64xf32>, vector<64x160xf32>, vector<8x160xf32> -> vector<8x160xf32>
    %237 = vector.extract_strided_slice %236 {offsets = [0, 0], sizes = [8, 128], strides = [1, 1]} : vector<8x160xf32> to vector<8x128xf32>
    %238 = vector.extract_strided_slice %236 {offsets = [0, 128], sizes = [8, 32], strides = [1, 1]} : vector<8x160xf32> to vector<8x32xf32>
    %c0_110 = arith.constant 0 : index
    %c0_111 = arith.constant 0 : index
    %239 = vector.load %arg14[%c0_110, %c0_111] : memref<32x32xf32, #tpu.memory_space<vmem>>, vector<32x32xf32>
    %cst_112 = arith.constant dense<0.000000e+00> : vector<8x32xf32>
    %240 = tpu.matmul %219, %239, %cst_112 {dimension_numbers = #tpu.dot_dimension_numbers<[1], [0], [0], [1], [0, 0, 1, 1], [], []>} : vector<8x32xf32>, vector<32x32xf32>, vector<8x32xf32> -> vector<8x32xf32>
    %241 = arith.addf %240, %238 : vector<8x32xf32>
    %242 = math.tanh %241 : vector<8x32xf32>
    %c0_113 = arith.constant 0 : index
    %c0_114 = arith.constant 0 : index
    %243 = vector.load %arg15[%c0_113, %c0_114] : memref<32x128xf32, #tpu.memory_space<vmem>>, vector<32x128xf32>
    %cst_115 = arith.constant dense<0.000000e+00> : vector<8x128xf32>
    %244 = tpu.matmul %242, %243, %cst_115 {dimension_numbers = #tpu.dot_dimension_numbers<[1], [0], [0], [1], [0, 0, 1, 1], [], []>} : vector<8x32xf32>, vector<32x128xf32>, vector<8x128xf32> -> vector<8x128xf32>
    %c0_116 = arith.constant 0 : index
    %c0_117 = arith.constant 0 : index
    %245 = vector.load %arg16[%c0_116, %c0_117] : memref<1x128xf32, #tpu.memory_space<vmem>>, vector<1x128xf32>
    %246 = vector.broadcast %245 : vector<1x128xf32> to vector<8x128xf32>
    %247 = arith.addf %244, %246 : vector<8x128xf32>
    %cst_118 = arith.constant dense<0xFF800000> : vector<8xf32>
    %248 = vector.multi_reduction <maximumf>, %247, %cst_118 [1] : vector<8x128xf32> to vector<8xf32>
    %249 = vector.shape_cast %248 : vector<8xf32> to vector<8x1xf32>
    %250 = vector.broadcast %249 : vector<8x1xf32> to vector<8x128xf32>
    %251 = arith.subf %247, %250 : vector<8x128xf32>
    %252 = math.exp %251 : vector<8x128xf32>
    %cst_119 = arith.constant dense<0.000000e+00> : vector<8xf32>
    %253 = vector.multi_reduction <add>, %252, %cst_119 [1] : vector<8x128xf32> to vector<8xf32>
    %254 = vector.shape_cast %253 : vector<8xf32> to vector<8x1xf32>
    %255 = math.log %254 : vector<8x1xf32>
    %256 = arith.addf %249, %255 : vector<8x1xf32>
    %257 = vector.broadcast %256 : vector<8x1xf32> to vector<8x128xf32>
    %258 = arith.subf %247, %257 : vector<8x128xf32>
    %c0_120 = arith.constant 0 : index
    %c256 = arith.constant 256 : index
    %259 = vector.load %arg17[%c0_120, %c256] : memref<8x640xf32, #tpu.memory_space<vmem>>, vector<8x128xf32>
    tpu.vector_store %arg17[%c0_120, %c256], %258 {strides = array<i32>} : memref<8x640xf32, #tpu.memory_space<vmem>>, vector<8x128xf32>,
    %c3 = arith.constant 3 : index
    %c0_121 = arith.constant 0 : index
    %c0_122 = arith.constant 0 : index
    %260 = vector.load %arg0[%c3, %c0_121, %c0_122] : memref<5x8x32xf32, #tpu.memory_space<vmem>>, vector<1x8x32xf32>
    %261 = vector.shape_cast %260 : vector<1x8x32xf32> to vector<8x32xf32>
    %262 = tpu.concatenate %261, %198 in 1 : vector<8x32xf32>, vector<8x32xf32> -> vector<8x64xf32>
    %c0_123 = arith.constant 0 : index
    %c0_124 = arith.constant 0 : index
    %263 = vector.load %arg10[%c0_123, %c0_124] : memref<64x128xf32, #tpu.memory_space<vmem>>, vector<64x128xf32>
    %cst_125 = arith.constant dense<0.000000e+00> : vector<8x128xf32>
    %264 = tpu.matmul %262, %263, %cst_125 {dimension_numbers = #tpu.dot_dimension_numbers<[1], [0], [0], [1], [0, 0, 1, 1], [], []>} : vector<8x64xf32>, vector<64x128xf32>, vector<8x128xf32> -> vector<8x128xf32>
    %265 = arith.addf %264, %237 : vector<8x128xf32>
    %c0_126 = arith.constant 0 : index
    %c0_127 = arith.constant 0 : index
    %266 = vector.load %arg11[%c0_126, %c0_127] : memref<1x128xf32, #tpu.memory_space<vmem>>, vector<1x128xf32>
    %267 = vector.broadcast %266 : vector<1x128xf32> to vector<8x128xf32>
    %268 = arith.addf %265, %267 : vector<8x128xf32>
    %269 = arith.negf %268 : vector<8x128xf32>
    %270 = math.exp %269 : vector<8x128xf32>
    %cst_128 = arith.constant 1.000000e+00 : f32
    %271 = vector.broadcast %cst_128 : f32 to vector<8x128xf32>
    %272 = arith.addf %271, %270 : vector<8x128xf32>
    %273 = arith.divf %271, %272 : vector<8x128xf32>
    %274 = math.tanh %268 : vector<8x128xf32>
    %275 = vector.extract_strided_slice %273 {offsets = [0, 0], sizes = [8, 32], strides = [1, 1]} : vector<8x128xf32> to vector<8x32xf32>
    %276 = vector.extract_strided_slice %273 {offsets = [0, 32], sizes = [8, 32], strides = [1, 1]} : vector<8x128xf32> to vector<8x32xf32>
    %277 = vector.extract_strided_slice %274 {offsets = [0, 64], sizes = [8, 32], strides = [1, 1]} : vector<8x128xf32> to vector<8x32xf32>
    %278 = vector.extract_strided_slice %273 {offsets = [0, 96], sizes = [8, 32], strides = [1, 1]} : vector<8x128xf32> to vector<8x32xf32>
    %279 = arith.mulf %276, %196 : vector<8x32xf32>
    %280 = arith.mulf %275, %277 : vector<8x32xf32>
    %281 = arith.addf %279, %280 : vector<8x32xf32>
    %282 = math.tanh %281 : vector<8x32xf32>
    %283 = arith.mulf %278, %282 : vector<8x32xf32>
    %284 = tpu.concatenate %283, %219 in 1 : vector<8x32xf32>, vector<8x32xf32> -> vector<8x64xf32>
    %c0_129 = arith.constant 0 : index
    %c0_130 = arith.constant 0 : index
    %285 = vector.load %arg12[%c0_129, %c0_130] : memref<64x128xf32, #tpu.memory_space<vmem>>, vector<64x128xf32>
    %cst_131 = arith.constant dense<0.000000e+00> : vector<8x128xf32>
    %286 = tpu.matmul %284, %285, %cst_131 {dimension_numbers = #tpu.dot_dimension_numbers<[1], [0], [0], [1], [0, 0, 1, 1], [], []>} : vector<8x64xf32>, vector<64x128xf32>, vector<8x128xf32> -> vector<8x128xf32>
    %c0_132 = arith.constant 0 : index
    %c0_133 = arith.constant 0 : index
    %287 = vector.load %arg13[%c0_132, %c0_133] : memref<1x128xf32, #tpu.memory_space<vmem>>, vector<1x128xf32>
    %288 = vector.broadcast %287 : vector<1x128xf32> to vector<8x128xf32>
    %289 = arith.addf %286, %288 : vector<8x128xf32>
    %290 = arith.negf %289 : vector<8x128xf32>
    %291 = math.exp %290 : vector<8x128xf32>
    %cst_134 = arith.constant 1.000000e+00 : f32
    %292 = vector.broadcast %cst_134 : f32 to vector<8x128xf32>
    %293 = arith.addf %292, %291 : vector<8x128xf32>
    %294 = arith.divf %292, %293 : vector<8x128xf32>
    %295 = math.tanh %289 : vector<8x128xf32>
    %296 = vector.extract_strided_slice %294 {offsets = [0, 0], sizes = [8, 32], strides = [1, 1]} : vector<8x128xf32> to vector<8x32xf32>
    %297 = vector.extract_strided_slice %294 {offsets = [0, 32], sizes = [8, 32], strides = [1, 1]} : vector<8x128xf32> to vector<8x32xf32>
    %298 = vector.extract_strided_slice %295 {offsets = [0, 64], sizes = [8, 32], strides = [1, 1]} : vector<8x128xf32> to vector<8x32xf32>
    %299 = vector.extract_strided_slice %294 {offsets = [0, 96], sizes = [8, 32], strides = [1, 1]} : vector<8x128xf32> to vector<8x32xf32>
    %300 = arith.mulf %297, %217 : vector<8x32xf32>
    %301 = arith.mulf %296, %298 : vector<8x32xf32>
    %302 = arith.addf %300, %301 : vector<8x32xf32>
    %303 = math.tanh %302 : vector<8x32xf32>
    %304 = arith.mulf %299, %303 : vector<8x32xf32>
    %c0_135 = arith.constant 0 : index
    %c0_136 = arith.constant 0 : index
    %305 = vector.load %arg1[%c0_135, %c0_136] : memref<32x64xf32, #tpu.memory_space<vmem>>, vector<32x64xf32>
    %cst_137 = arith.constant dense<0.000000e+00> : vector<8x64xf32>
    %306 = tpu.matmul %304, %305, %cst_137 {dimension_numbers = #tpu.dot_dimension_numbers<[1], [0], [0], [1], [0, 0, 1, 1], [], []>} : vector<8x32xf32>, vector<32x64xf32>, vector<8x64xf32> -> vector<8x64xf32>
    %c0_138 = arith.constant 0 : index
    %c0_139 = arith.constant 0 : index
    %307 = vector.load %arg4[%c0_138, %c0_139] : memref<8x64xf32, #tpu.memory_space<vmem>>, vector<8x64xf32>
    %308 = arith.addf %306, %307 : vector<8x64xf32>
    %cst_140 = arith.constant dense<0xFF800000> : vector<8xf32>
    %309 = vector.multi_reduction <maximumf>, %308, %cst_140 [1] : vector<8x64xf32> to vector<8xf32>
    %310 = vector.shape_cast %309 : vector<8xf32> to vector<8x1xf32>
    %311 = vector.broadcast %310 : vector<8x1xf32> to vector<8x64xf32>
    %312 = arith.subf %308, %311 : vector<8x64xf32>
    %313 = math.exp %312 : vector<8x64xf32>
    %c0_141 = arith.constant 0 : index
    %c0_142 = arith.constant 0 : index
    %314 = vector.load %arg3[%c0_141, %c0_142] : memref<8x64xf32, #tpu.memory_space<vmem>>, vector<8x64xf32>
    %315 = arith.mulf %313, %314 : vector<8x64xf32>
    %cst_143 = arith.constant dense<0.000000e+00> : vector<8xf32>
    %316 = vector.multi_reduction <add>, %315, %cst_143 [1] : vector<8x64xf32> to vector<8xf32>
    %317 = vector.shape_cast %316 : vector<8xf32> to vector<8x1xf32>
    %318 = vector.broadcast %317 : vector<8x1xf32> to vector<8x64xf32>
    %319 = arith.divf %315, %318 : vector<8x64xf32>
    %c0_144 = arith.constant 0 : index
    %c0_145 = arith.constant 0 : index
    %320 = vector.load %arg2[%c0_144, %c0_145] : memref<64x160xf32, #tpu.memory_space<vmem>>, vector<64x160xf32>
    %cst_146 = arith.constant dense<0.000000e+00> : vector<8x160xf32>
    %321 = tpu.matmul %319, %320, %cst_146 {dimension_numbers = #tpu.dot_dimension_numbers<[1], [0], [0], [1], [0, 0, 1, 1], [], []>} : vector<8x64xf32>, vector<64x160xf32>, vector<8x160xf32> -> vector<8x160xf32>
    %322 = vector.extract_strided_slice %321 {offsets = [0, 0], sizes = [8, 128], strides = [1, 1]} : vector<8x160xf32> to vector<8x128xf32>
    %323 = vector.extract_strided_slice %321 {offsets = [0, 128], sizes = [8, 32], strides = [1, 1]} : vector<8x160xf32> to vector<8x32xf32>
    %c0_147 = arith.constant 0 : index
    %c0_148 = arith.constant 0 : index
    %324 = vector.load %arg14[%c0_147, %c0_148] : memref<32x32xf32, #tpu.memory_space<vmem>>, vector<32x32xf32>
    %cst_149 = arith.constant dense<0.000000e+00> : vector<8x32xf32>
    %325 = tpu.matmul %304, %324, %cst_149 {dimension_numbers = #tpu.dot_dimension_numbers<[1], [0], [0], [1], [0, 0, 1, 1], [], []>} : vector<8x32xf32>, vector<32x32xf32>, vector<8x32xf32> -> vector<8x32xf32>
    %326 = arith.addf %325, %323 : vector<8x32xf32>
    %327 = math.tanh %326 : vector<8x32xf32>
    %c0_150 = arith.constant 0 : index
    %c0_151 = arith.constant 0 : index
    %328 = vector.load %arg15[%c0_150, %c0_151] : memref<32x128xf32, #tpu.memory_space<vmem>>, vector<32x128xf32>
    %cst_152 = arith.constant dense<0.000000e+00> : vector<8x128xf32>
    %329 = tpu.matmul %327, %328, %cst_152 {dimension_numbers = #tpu.dot_dimension_numbers<[1], [0], [0], [1], [0, 0, 1, 1], [], []>} : vector<8x32xf32>, vector<32x128xf32>, vector<8x128xf32> -> vector<8x128xf32>
    %c0_153 = arith.constant 0 : index
    %c0_154 = arith.constant 0 : index
    %330 = vector.load %arg16[%c0_153, %c0_154] : memref<1x128xf32, #tpu.memory_space<vmem>>, vector<1x128xf32>
    %331 = vector.broadcast %330 : vector<1x128xf32> to vector<8x128xf32>
    %332 = arith.addf %329, %331 : vector<8x128xf32>
    %cst_155 = arith.constant dense<0xFF800000> : vector<8xf32>
    %333 = vector.multi_reduction <maximumf>, %332, %cst_155 [1] : vector<8x128xf32> to vector<8xf32>
    %334 = vector.shape_cast %333 : vector<8xf32> to vector<8x1xf32>
    %335 = vector.broadcast %334 : vector<8x1xf32> to vector<8x128xf32>
    %336 = arith.subf %332, %335 : vector<8x128xf32>
    %337 = math.exp %336 : vector<8x128xf32>
    %cst_156 = arith.constant dense<0.000000e+00> : vector<8xf32>
    %338 = vector.multi_reduction <add>, %337, %cst_156 [1] : vector<8x128xf32> to vector<8xf32>
    %339 = vector.shape_cast %338 : vector<8xf32> to vector<8x1xf32>
    %340 = math.log %339 : vector<8x1xf32>
    %341 = arith.addf %334, %340 : vector<8x1xf32>
    %342 = vector.broadcast %341 : vector<8x1xf32> to vector<8x128xf32>
    %343 = arith.subf %332, %342 : vector<8x128xf32>
    %c0_157 = arith.constant 0 : index
    %c384 = arith.constant 384 : index
    %344 = vector.load %arg17[%c0_157, %c384] : memref<8x640xf32, #tpu.memory_space<vmem>>, vector<8x128xf32>
    tpu.vector_store %arg17[%c0_157, %c384], %343 {strides = array<i32>} : memref<8x640xf32, #tpu.memory_space<vmem>>, vector<8x128xf32>,
    %c4 = arith.constant 4 : index
    %c0_158 = arith.constant 0 : index
    %c0_159 = arith.constant 0 : index
    %345 = vector.load %arg0[%c4, %c0_158, %c0_159] : memref<5x8x32xf32, #tpu.memory_space<vmem>>, vector<1x8x32xf32>
    %346 = vector.shape_cast %345 : vector<1x8x32xf32> to vector<8x32xf32>
    %347 = tpu.concatenate %346, %283 in 1 : vector<8x32xf32>, vector<8x32xf32> -> vector<8x64xf32>
    %c0_160 = arith.constant 0 : index
    %c0_161 = arith.constant 0 : index
    %348 = vector.load %arg10[%c0_160, %c0_161] : memref<64x128xf32, #tpu.memory_space<vmem>>, vector<64x128xf32>
    %cst_162 = arith.constant dense<0.000000e+00> : vector<8x128xf32>
    %349 = tpu.matmul %347, %348, %cst_162 {dimension_numbers = #tpu.dot_dimension_numbers<[1], [0], [0], [1], [0, 0, 1, 1], [], []>} : vector<8x64xf32>, vector<64x128xf32>, vector<8x128xf32> -> vector<8x128xf32>
    %350 = arith.addf %349, %322 : vector<8x128xf32>
    %c0_163 = arith.constant 0 : index
    %c0_164 = arith.constant 0 : index
    %351 = vector.load %arg11[%c0_163, %c0_164] : memref<1x128xf32, #tpu.memory_space<vmem>>, vector<1x128xf32>
    %352 = vector.broadcast %351 : vector<1x128xf32> to vector<8x128xf32>
    %353 = arith.addf %350, %352 : vector<8x128xf32>
    %354 = arith.negf %353 : vector<8x128xf32>
    %355 = math.exp %354 : vector<8x128xf32>
    %cst_165 = arith.constant 1.000000e+00 : f32
    %356 = vector.broadcast %cst_165 : f32 to vector<8x128xf32>
    %357 = arith.addf %356, %355 : vector<8x128xf32>
    %358 = arith.divf %356, %357 : vector<8x128xf32>
    %359 = math.tanh %353 : vector<8x128xf32>
    %360 = vector.extract_strided_slice %358 {offsets = [0, 0], sizes = [8, 32], strides = [1, 1]} : vector<8x128xf32> to vector<8x32xf32>
    %361 = vector.extract_strided_slice %358 {offsets = [0, 32], sizes = [8, 32], strides = [1, 1]} : vector<8x128xf32> to vector<8x32xf32>
    %362 = vector.extract_strided_slice %359 {offsets = [0, 64], sizes = [8, 32], strides = [1, 1]} : vector<8x128xf32> to vector<8x32xf32>
    %363 = vector.extract_strided_slice %358 {offsets = [0, 96], sizes = [8, 32], strides = [1, 1]} : vector<8x128xf32> to vector<8x32xf32>
    %364 = arith.mulf %361, %281 : vector<8x32xf32>
    %365 = arith.mulf %360, %362 : vector<8x32xf32>
    %366 = arith.addf %364, %365 : vector<8x32xf32>
    %367 = math.tanh %366 : vector<8x32xf32>
    %368 = arith.mulf %363, %367 : vector<8x32xf32>
    %369 = tpu.concatenate %368, %304 in 1 : vector<8x32xf32>, vector<8x32xf32> -> vector<8x64xf32>
    %c0_166 = arith.constant 0 : index
    %c0_167 = arith.constant 0 : index
    %370 = vector.load %arg12[%c0_166, %c0_167] : memref<64x128xf32, #tpu.memory_space<vmem>>, vector<64x128xf32>
    %cst_168 = arith.constant dense<0.000000e+00> : vector<8x128xf32>
    %371 = tpu.matmul %369, %370, %cst_168 {dimension_numbers = #tpu.dot_dimension_numbers<[1], [0], [0], [1], [0, 0, 1, 1], [], []>} : vector<8x64xf32>, vector<64x128xf32>, vector<8x128xf32> -> vector<8x128xf32>
    %c0_169 = arith.constant 0 : index
    %c0_170 = arith.constant 0 : index
    %372 = vector.load %arg13[%c0_169, %c0_170] : memref<1x128xf32, #tpu.memory_space<vmem>>, vector<1x128xf32>
    %373 = vector.broadcast %372 : vector<1x128xf32> to vector<8x128xf32>
    %374 = arith.addf %371, %373 : vector<8x128xf32>
    %375 = arith.negf %374 : vector<8x128xf32>
    %376 = math.exp %375 : vector<8x128xf32>
    %cst_171 = arith.constant 1.000000e+00 : f32
    %377 = vector.broadcast %cst_171 : f32 to vector<8x128xf32>
    %378 = arith.addf %377, %376 : vector<8x128xf32>
    %379 = arith.divf %377, %378 : vector<8x128xf32>
    %380 = math.tanh %374 : vector<8x128xf32>
    %381 = vector.extract_strided_slice %379 {offsets = [0, 0], sizes = [8, 32], strides = [1, 1]} : vector<8x128xf32> to vector<8x32xf32>
    %382 = vector.extract_strided_slice %379 {offsets = [0, 32], sizes = [8, 32], strides = [1, 1]} : vector<8x128xf32> to vector<8x32xf32>
    %383 = vector.extract_strided_slice %380 {offsets = [0, 64], sizes = [8, 32], strides = [1, 1]} : vector<8x128xf32> to vector<8x32xf32>
    %384 = vector.extract_strided_slice %379 {offsets = [0, 96], sizes = [8, 32], strides = [1, 1]} : vector<8x128xf32> to vector<8x32xf32>
    %385 = arith.mulf %382, %302 : vector<8x32xf32>
    %386 = arith.mulf %381, %383 : vector<8x32xf32>
    %387 = arith.addf %385, %386 : vector<8x32xf32>
    %388 = math.tanh %387 : vector<8x32xf32>
    %389 = arith.mulf %384, %388 : vector<8x32xf32>
    %c0_172 = arith.constant 0 : index
    %c0_173 = arith.constant 0 : index
    %390 = vector.load %arg1[%c0_172, %c0_173] : memref<32x64xf32, #tpu.memory_space<vmem>>, vector<32x64xf32>
    %cst_174 = arith.constant dense<0.000000e+00> : vector<8x64xf32>
    %391 = tpu.matmul %389, %390, %cst_174 {dimension_numbers = #tpu.dot_dimension_numbers<[1], [0], [0], [1], [0, 0, 1, 1], [], []>} : vector<8x32xf32>, vector<32x64xf32>, vector<8x64xf32> -> vector<8x64xf32>
    %c0_175 = arith.constant 0 : index
    %c0_176 = arith.constant 0 : index
    %392 = vector.load %arg4[%c0_175, %c0_176] : memref<8x64xf32, #tpu.memory_space<vmem>>, vector<8x64xf32>
    %393 = arith.addf %391, %392 : vector<8x64xf32>
    %cst_177 = arith.constant dense<0xFF800000> : vector<8xf32>
    %394 = vector.multi_reduction <maximumf>, %393, %cst_177 [1] : vector<8x64xf32> to vector<8xf32>
    %395 = vector.shape_cast %394 : vector<8xf32> to vector<8x1xf32>
    %396 = vector.broadcast %395 : vector<8x1xf32> to vector<8x64xf32>
    %397 = arith.subf %393, %396 : vector<8x64xf32>
    %398 = math.exp %397 : vector<8x64xf32>
    %c0_178 = arith.constant 0 : index
    %c0_179 = arith.constant 0 : index
    %399 = vector.load %arg3[%c0_178, %c0_179] : memref<8x64xf32, #tpu.memory_space<vmem>>, vector<8x64xf32>
    %400 = arith.mulf %398, %399 : vector<8x64xf32>
    %cst_180 = arith.constant dense<0.000000e+00> : vector<8xf32>
    %401 = vector.multi_reduction <add>, %400, %cst_180 [1] : vector<8x64xf32> to vector<8xf32>
    %402 = vector.shape_cast %401 : vector<8xf32> to vector<8x1xf32>
    %403 = vector.broadcast %402 : vector<8x1xf32> to vector<8x64xf32>
    %404 = arith.divf %400, %403 : vector<8x64xf32>
    %c0_181 = arith.constant 0 : index
    %c0_182 = arith.constant 0 : index
    %405 = vector.load %arg2[%c0_181, %c0_182] : memref<64x160xf32, #tpu.memory_space<vmem>>, vector<64x160xf32>
    %cst_183 = arith.constant dense<0.000000e+00> : vector<8x160xf32>
    %406 = tpu.matmul %404, %405, %cst_183 {dimension_numbers = #tpu.dot_dimension_numbers<[1], [0], [0], [1], [0, 0, 1, 1], [], []>} : vector<8x64xf32>, vector<64x160xf32>, vector<8x160xf32> -> vector<8x160xf32>
    %407 = vector.extract_strided_slice %406 {offsets = [0, 128], sizes = [8, 32], strides = [1, 1]} : vector<8x160xf32> to vector<8x32xf32>
    %c0_184 = arith.constant 0 : index
    %c0_185 = arith.constant 0 : index
    %408 = vector.load %arg14[%c0_184, %c0_185] : memref<32x32xf32, #tpu.memory_space<vmem>>, vector<32x32xf32>
    %cst_186 = arith.constant dense<0.000000e+00> : vector<8x32xf32>
    %409 = tpu.matmul %389, %408, %cst_186 {dimension_numbers = #tpu.dot_dimension_numbers<[1], [0], [0], [1], [0, 0, 1, 1], [], []>} : vector<8x32xf32>, vector<32x32xf32>, vector<8x32xf32> -> vector<8x32xf32>
    %410 = arith.addf %409, %407 : vector<8x32xf32>
    %411 = math.tanh %410 : vector<8x32xf32>
    %c0_187 = arith.constant 0 : index
    %c0_188 = arith.constant 0 : index
    %412 = vector.load %arg15[%c0_187, %c0_188] : memref<32x128xf32, #tpu.memory_space<vmem>>, vector<32x128xf32>
    %cst_189 = arith.constant dense<0.000000e+00> : vector<8x128xf32>
    %413 = tpu.matmul %411, %412, %cst_189 {dimension_numbers = #tpu.dot_dimension_numbers<[1], [0], [0], [1], [0, 0, 1, 1], [], []>} : vector<8x32xf32>, vector<32x128xf32>, vector<8x128xf32> -> vector<8x128xf32>
    %c0_190 = arith.constant 0 : index
    %c0_191 = arith.constant 0 : index
    %414 = vector.load %arg16[%c0_190, %c0_191] : memref<1x128xf32, #tpu.memory_space<vmem>>, vector<1x128xf32>
    %415 = vector.broadcast %414 : vector<1x128xf32> to vector<8x128xf32>
    %416 = arith.addf %413, %415 : vector<8x128xf32>
    %cst_192 = arith.constant dense<0xFF800000> : vector<8xf32>
    %417 = vector.multi_reduction <maximumf>, %416, %cst_192 [1] : vector<8x128xf32> to vector<8xf32>
    %418 = vector.shape_cast %417 : vector<8xf32> to vector<8x1xf32>
    %419 = vector.broadcast %418 : vector<8x1xf32> to vector<8x128xf32>
    %420 = arith.subf %416, %419 : vector<8x128xf32>
    %421 = math.exp %420 : vector<8x128xf32>
    %cst_193 = arith.constant dense<0.000000e+00> : vector<8xf32>
    %422 = vector.multi_reduction <add>, %421, %cst_193 [1] : vector<8x128xf32> to vector<8xf32>
    %423 = vector.shape_cast %422 : vector<8xf32> to vector<8x1xf32>
    %424 = math.log %423 : vector<8x1xf32>
    %425 = arith.addf %418, %424 : vector<8x1xf32>
    %426 = vector.broadcast %425 : vector<8x1xf32> to vector<8x128xf32>
    %427 = arith.subf %416, %426 : vector<8x128xf32>
    %c0_194 = arith.constant 0 : index
    %c512 = arith.constant 512 : index
    %428 = vector.load %arg17[%c0_194, %c512] : memref<8x640xf32, #tpu.memory_space<vmem>>, vector<8x128xf32>
    tpu.vector_store %arg17[%c0_194, %c512], %427 {strides = array<i32>} : memref<8x640xf32, #tpu.memory_space<vmem>>, vector<8x128xf32>,
    return
  }
}

</mosaic_0001>

<bundles_post_ra>
// kernel: _decoder_forward.1
= control target key start
LH: loop header
LB: loop body
LE: loop exit
PB: predicated region body
PF: predicated region fallthrough
CT: control target
= control target key end

     0   :  { %v5030_v1 = vmov 0.0   ;;  %vm3754_vm0 = vmmov 0   ;;  %s3755_s18 = smov 32   ;;  %vm66_vm1 = vcmask 261120   ;;  %vm76_vm2 = vcmask 523264   ;;  %s3756_s24 = smov 64   ;;  %s5011_s5 = inlined_call_operand.vmem [shape: f32[8,32], index: 5, kind: input, shape index: {}]   ;;  %s5012_s10 = inlined_call_operand.vmem [shape: f32[64,128], index: 10, kind: input, shape index: {}]   ;;  %s5013_s6 = inlined_call_operand.vmem [shape: f32[8,32], index: 6, kind: input, shape index: {}]   ;;  %s5014_s0 = inlined_call_operand.vmem [shape: f32[5,8,32], index: 0, kind: input, shape index: {}]   ;;  %s5015_s9 = inlined_call_operand.vmem [shape: f32[8,128], index: 9, kind: input, shape index: {}]   ;;  %s5016_s11 = inlined_call_operand.vmem [shape: f32[1,128], index: 11, kind: input, shape index: {}]   ;;  %s5017_s12 = inlined_call_operand.vmem [shape: f32[64,128], index: 12, kind: input, shape index: {}]   ;;  %s5018_s7 = inlined_call_operand.vmem [shape: f32[8,32], index: 7, kind: input, shape index: {}]   ;;  %s5019_s8 = inlined_call_operand.vmem [shape: f32[8,32], index: 8, kind: input, shape index: {}]   ;;  %s5020_s13 = inlined_call_operand.vmem [shape: f32[1,128], index: 13, kind: input, shape index: {}]   ;;  %s5021_s1 = inlined_call_operand.vmem [shape: f32[32,64], index: 1, kind: input, shape index: {}]   ;;  %s5022_s14 = inlined_call_operand.vmem [shape: f32[32,32], index: 14, kind: input, shape index: {}]   ;;  %s5023_s4 = inlined_call_operand.vmem [shape: f32[8,64], index: 4, kind: input, shape index: {}]   ;;  %s5024_s2 = inlined_call_operand.vmem [shape: f32[64,160], index: 2, kind: input, shape index: {}]   ;;  %s5025_s3 = inlined_call_operand.vmem [shape: f32[8,64], index: 3, kind: input, shape index: {}]   ;;  %s5026_s15 = inlined_call_operand.vmem [shape: f32[32,128], index: 15, kind: input, shape index: {}]   ;;  %s5027_s16 = inlined_call_operand.vmem [shape: f32[1,128], index: 16, kind: input, shape index: {}]   ;;  %s5028_s17 = inlined_call_operand.vmem [shape: f32[8,640], index: 17, kind: output, shape index: {}]  }
   0x1   :  { %5034 = sst [smem:[#allocation5_spill]] %s5011_s5  ;;  %3264 = vmatprep.subr.mxu0 %v5030_v1  ;;  %3280 = vmatprep.mubr.msk.f32.mxu0 %vm3754_vm0, %v5030_v1  ;;  %v57_v5 = vld [vmem:[%s5013_s6] sm:$0xff]  ;;  %v3941_v31 = vld [vmem:[%s5017_s12 + $0x38] sm:$0xff]  ;;  %v3946_v32 = vld [vmem:[%s5017_s12 + $0x30] sm:$0xff] }
   0x2   :  { %5035 = sst [smem:[#allocation6_spill]] %s5012_s10  ;;  %3283 = vmatprep.subr.mxu1 %v5030_v1  ;;  %3299 = vmatprep.mubr.msk.f32.mxu1 %vm3754_vm0, %v5030_v1  ;;  %v61_v11 = vld [vmem:[%s5014_s0] sm:$0xff]  ;;  %v3953_v33 = vld [vmem:[%s5017_s12 + $0x28] sm:$0xff]  ;;  %v3967_v35 = vld [vmem:[%s5017_s12 + $0x18] sm:$0xff] }
   0x3   :  { %s5036_s26 = sld [smem:[#allocation5_spill]]  ;;  %166 = vrot.lane.b32.xlu1 %v57_v5, %s3755_s18  ;;  %v60_v14 = vld [vmem:[%s5015_s9] sm:$0xff]  ;;  %3284 = vmatpush3.msra.mxu1 %v3941_v31  ;;  %v3974_v36 = vld [vmem:[%s5017_s12 + $0x10] sm:$0xff]  ;;  %v3982_v38 = vld [vmem:[%s5017_s12 + $0x8] sm:$0xff] }
   0x4   :  { %s5037_s29 = sld [smem:[#allocation6_spill]]  ;;  %v3930_v16 = vld [vmem:[%s5016_s11] ss:$0 sm:$0xff]  ;;  %3285 = vmatprep.subr.mxu1 %v5030_v1  ;;  %v4023_v62 = vld [vmem:[%s5021_s1 + $0x18] sm:$0xff]  ;;  %v4028_v63 = vld [vmem:[%s5021_s1 + $0x10] sm:$0xff] }
   0x5   :  { %3286 = vmatpush3.msra.mxu1 %v3946_v32  ;;  %v3960_v34 = vld [vmem:[%s5017_s12 + $0x20] sm:$0xff] }
   0x6   :  { %3287 = vmatprep.subr.mxu1 %v5030_v1  ;;  %v58_v39 = vld [vmem:[%s5018_s7] sm:$0xff] }
   0x7   :  { %3288 = vmatpush3.msra.mxu1 %v3953_v33  ;;  %v3995_v40 = vld [vmem:[%s5017_s12] sm:$0xff] }
   0x8   :  { %3289 = vmatprep.subr.mxu1 %v5030_v1  ;;  %v59_v41 = vld [vmem:[%s5019_s8] sm:$0xff] }
   0x9   :  { %v56_v0 = vld [vmem:[%s5036_s26] sm:$0xff]  ;;  %3290 = vmatpush3.msra.mxu1 %v3960_v34 }
   0xa   :  { %v3854_v2 = vld [vmem:[%s5037_s29 + $0x38] sm:$0xff]  ;;  %v3859_v3 = vld [vmem:[%s5037_s29 + $0x30] sm:$0xff]  ;;  %63 = vrot.lane.b32.xlu0 %v56_v0, %s3755_s18  ;;  %v3869_v4 = vld [vmem:[%s5037_s29 + $0x28] sm:$0xff]  ;;  %3291 = vmatprep.subr.mxu1 %v5030_v1 }
   0xb   :  { %3265 = vmatpush3.msra.mxu0 %v3854_v2  ;;  %v3882_v6 = vld [vmem:[%s5037_s29 + $0x20] sm:$0xff]  ;;  %v3890_v7 = vld [vmem:[%s5037_s29 + $0x18] sm:$0xff]  ;;  %v3897_v8 = vld [vmem:[%s5037_s29 + $0x10] sm:$0xff]  ;;  %3292 = vmatpush3.msra.mxu1 %v3967_v35 }
   0xc   :  { %3266 = vmatprep.subr.mxu0 %v5030_v1  ;;  %v3904_v9 = vld [vmem:[%s5037_s29 + $0x8] sm:$0xff]  ;;  %v3911_v10 = vld [vmem:[%s5037_s29] sm:$0xff]  ;;  %3293 = vmatprep.subr.mxu1 %v5030_v1 }
   0xd   :  { %3267 = vmatpush3.msra.mxu0 %v3859_v3  ;;  %3294 = vmatpush3.msra.mxu1 %v3974_v36  ;;  %v4012_v47 = vld [vmem:[%s5020_s13] ss:$0 sm:$0xff]  ;;  %v4035_v0 = vld [vmem:[%s5021_s1 + $0x8] sm:$0xff] }
   0xe   :  { %3268 = vmatprep.subr.mxu0 %v5030_v1  ;;  %3295 = vmatprep.subr.mxu1 %v5030_v1  ;;  %v4042_v5 = vld [vmem:[%s5021_s1] sm:$0xff] }
   0xf   :  { %3269 = vmatpush3.msra.mxu0 %v3869_v4  ;;  %3296 = vmatpush3.msra.mxu1 %v3982_v38 }
  0x10   :  { %3270 = vmatprep.subr.mxu0 %v5030_v1  ;;  %3297 = vmatprep.subr.mxu1 %v5030_v1 }
  0x11   :  { %3271 = vmatpush3.msra.mxu0 %v3882_v6  ;;  %3298 = vmatpush3.msra.mxu1 %v3995_v40 }
  0x12   :  { %3272 = vmatprep.subr.mxu0 %v5030_v1 }
  0x13   :  { %3273 = vmatpush3.msra.mxu0 %v3890_v7 }
  0x14   :  { %3274 = vmatprep.subr.mxu0 %v5030_v1 }
  0x15   :  { %3275 = vmatpush3.msra.mxu0 %v3897_v8 }
  0x16   :  { %3276 = vmatprep.subr.mxu0 %v5030_v1 }
  0x17   :  { %3277 = vmatpush3.msra.mxu0 %v3904_v9 }
  0x18   :  { %3278 = vmatprep.subr.mxu0 %v5030_v1 }
  0x19   :  { %3279 = vmatpush3.msra.mxu0 %v3911_v10 }
  0x1a   :  { %3302 = vmatprep.subr.mxu0 %v5030_v1 }
  0x75   :  { %v167_v27 = vpop.permute.xlu1 %166 }
  0x7c   :  { %v64_v12 = vpop.permute.xlu0 %63 }
  0x7d   :  { %v67_v13 = vsel %vm66_vm1, %v61_v11, %v64_v12 }
  0x7e   :  { %3281 = vmatmul.mubr.msk.f32.vlgmr.msra.gmra.mxu0 %vm76_vm2, %v67_v13 }
  0x7f   :  { %3310 = vmatprep.mubr.msk.f32.mxu0 %vm3754_vm0, %v5030_v1  ;;  %3303 = vmatpush3.msra.mxu0 %v4023_v62 }
  0x80   :  { %3304 = vmatprep.subr.mxu0 %v5030_v1 }
  0x81   :  { %3305 = vmatpush3.msra.mxu0 %v4028_v63 }
  0x82   :  { %3306 = vmatprep.subr.mxu0 %v5030_v1 }
  0x83   :  { %3307 = vmatpush3.msra.mxu0 %v4035_v0 }
  0x84   :  { %3308 = vmatprep.subr.mxu0 %v5030_v1 }
  0x85   :  { %3309 = vmatpush3.msra.mxu0 %v4042_v5 }
  0x86   :  { %3313 = vmatprep.subr.mxu0 %v5030_v1 }
 0x13e   :  { %v146_v15 = vpop.f32.mrf.mxu0 }
 0x13f   :  { %v147_v17 = vadd.f32 %v146_v15, %v60_v14  ;;  %v4056_v14 = vld [vmem:[%s5022_s14 + $0x18] sm:$0xff] }
 0x140   :  { %v3282_v18 = vpop.f32.mrf.mxu0 }
 0x141   :  { %v157_v19 = vadd.f32 %v3930_v16, %v147_v17  ;;  %v4062_v17 = vld [vmem:[%s5022_s14 + $0x10] sm:$0xff]  ;;  %v4071_v18 = vld [vmem:[%s5022_s14 + $0x8] sm:$0xff] }
 0x143   :  { %3623 = vtanh.f32 %v157_v19  ;;  %v3042_v21 = vmul.f32 -1.442695, %v157_v19  ;;  %v4078_v19 = vld [vmem:[%s5022_s14] sm:$0xff] }
 0x145   :  { %3625 = vpow2.f32 %v3042_v21 }
 0x150   :  { %v3624_v20 = vpop.eup %3623 }
 0x151   :  { %171 = vrot.lane.b32.xlu0 %v3624_v20, %s3756_s24  ;;  %v4090_v20 = vld [vmem:[%s5023_s4] sm:$0xff] }
 0x152   :  { %v3626_v22 = vpop.eup %3625  ;;  %5038 = vst [vmem:[#allocation2_spill] sm:$0xff] %v4090_v20 }
 0x153   :  { %v161_v23 = vadd.f32 1.0, %v3626_v22 }
 0x155   :  { %3627 = vrcp.f32 %v161_v23 }
 0x162   :  { %v3628_v24 = vpop.eup %3627 }
 0x163   :  { %v169_v28 = vmul.f32 %v3628_v24, %v167_v27  ;;  %v4101_v27 = vld [vmem:[%s5024_s2 + $0x78] sm:$0xff] }
 0x164   :  { %439 = vmatprep.subr.mxu1 %v4101_v27 }
 0x1c3   :  { %v172_v25 = vpop.permute.xlu0 %171 }
 0x1c4   :  { %v174_v26 = vmul.f32 %v3628_v24, %v172_v25 }
 0x1c6   :  { %176 = vrot.lane.b32.xlu1 %v174_v26, %s3755_s18 }
 0x238   :  { %v177_v29 = vpop.permute.xlu1 %176 }
 0x239   :  { %v3935_v30 = vadd.f32 %v177_v29, %v169_v28 }
 0x23b   :  { %3629 = vtanh.f32 %v3935_v30 }
 0x248   :  { %v3630_v37 = vpop.eup %3629 }
 0x249   :  { %182 = vrot.lane.b32.xlu0 %v3630_v37, %s3756_s24 }
 0x24d   :  { %191 = vrot.lane.b32.xlu0 %v58_v39, %s3755_s18  ;;  %v4107_v39 = vld [vmem:[%s5025_s3] sm:$0xff] }
 0x251   :  { %291 = vrot.lane.b32.xlu0 %v59_v41, %s3755_s18 }
 0x2bb   :  { %v183_v42 = vpop.permute.xlu0 %182 }
 0x2bc   :  { %v4002_v43 = vmul.f32 %v3628_v24, %v183_v42 }
 0x2be   :  { %187 = vrot.lane.b32.xlu1 %v4002_v43, %s3755_s18 }
 0x2bf   :  { %v192_v44 = vpop.permute.xlu0 %191 }
 0x2c3   :  { %v292_v58 = vpop.permute.xlu0 %291 }
 0x330   :  { %v188_v45 = vpop.permute.xlu1 %187 }
 0x331   :  { %v194_v46 = vsel %vm66_vm1, %v188_v45, %v192_v44  ;;  %v4114_v44 = vld [vmem:[%s5024_s2 + $0x70] sm:$0xff]  ;;  %v4119_v45 = vld [vmem:[%s5024_s2 + $0x68] sm:$0xff] }
 0x332   :  { %3300 = vmatmul.mubr.msk.f32.vlgmr.msra.gmra.mxu1 %vm76_vm2, %v194_v46  ;;  %v4124_v46 = vld [vmem:[%s5024_s2 + $0x60] sm:$0xff] }
 0x333   :  { %487 = vmatprep.mubr.f32.mxu1 %v5030_v1  ;;  %440 = vmatpush1.msra.mxu1 %v4114_v44 }
 0x334   :  { %441 = vmatprep.subr.mxu1 %v4119_v45 }
 0x335   :  { %442 = vmatpush1.msra.mxu1 %v4124_v46 }
 0x3f2   :  { %v279_v48 = vpop.f32.mrf.mxu1 }
 0x3f3   :  { %v280_v49 = vadd.f32 %v4012_v47, %v279_v48  ;;  %v4130_v48 = vld [vmem:[%s5024_s2 + $0x58] sm:$0xff] }
 0x3f4   :  { %v3301_v50 = vpop.f32.mrf.mxu1  ;;  %443 = vmatprep.subr.mxu1 %v4130_v48 }
 0x3f5   :  { %3631 = vtanh.f32 %v280_v49  ;;  %v3045_v52 = vmul.f32 -1.442695, %v280_v49  ;;  %v4136_v49 = vld [vmem:[%s5024_s2 + $0x50] sm:$0xff]  ;;  %v4142_v50 = vld [vmem:[%s5024_s2 + $0x48] sm:$0xff] }
 0x3f6   :  { %444 = vmatpush1.msra.mxu1 %v4136_v49 }
 0x3f7   :  { %3633 = vpow2.f32 %v3045_v52  ;;  %v4154_v52 = vld [vmem:[%s5024_s2 + $0x38] sm:$0xff]  ;;  %445 = vmatprep.subr.mxu1 %v4142_v50 }
 0x402   :  { %v3632_v51 = vpop.eup %3631 }
 0x403   :  { %296 = vrot.lane.b32.xlu1 %v3632_v51, %s3756_s24  ;;  %v4148_v51 = vld [vmem:[%s5024_s2 + $0x40] sm:$0xff] }
 0x404   :  { %v3634_v53 = vpop.eup %3633  ;;  %446 = vmatpush1.msra.mxu1 %v4148_v51 }
 0x405   :  { %v286_v54 = vadd.f32 1.0, %v3634_v53  ;;  %v4160_v53 = vld [vmem:[%s5024_s2 + $0x30] sm:$0xff]  ;;  %447 = vmatprep.subr.mxu1 %v4154_v52 }
 0x406   :  { %448 = vmatpush1.msra.mxu1 %v4160_v53 }
 0x407   :  { %3635 = vrcp.f32 %v286_v54  ;;  %v4166_v54 = vld [vmem:[%s5024_s2 + $0x28] sm:$0xff] }
 0x408   :  { %449 = vmatprep.subr.mxu1 %v4166_v54 }
 0x414   :  { %v3636_v55 = vpop.eup %3635 }
 0x415   :  { %v294_v59 = vmul.f32 %v3636_v55, %v292_v58  ;;  %v4190_v58 = vld [vmem:[%s5024_s2 + $0x8] sm:$0xff] }
 0x475   :  { %v297_v56 = vpop.permute.xlu1 %296 }
 0x476   :  { %v299_v57 = vmul.f32 %v3636_v55, %v297_v56  ;;  %v4178_v56 = vld [vmem:[%s5024_s2 + $0x18] sm:$0xff] }
 0x478   :  { %301 = vrot.lane.b32.xlu1 %v299_v57, %s3755_s18  ;;  %v4184_v57 = vld [vmem:[%s5024_s2 + $0x10] sm:$0xff] }
 0x4ea   :  { %v302_v60 = vpop.permute.xlu1 %301 }
 0x4eb   :  { %v4017_v61 = vadd.f32 %v302_v60, %v294_v59  ;;  %v4196_v59 = vld [vmem:[%s5024_s2] sm:$0xff] }
 0x4ec   :  { %5039 = vst [vmem:[#allocation3_spill] sm:$0xff] %v4196_v59 }
 0x4ed   :  { %3637 = vtanh.f32 %v4017_v61 }
 0x4fa   :  { %v3638_v11 = vpop.eup %3637 }
 0x4fb   :  { %307 = vrot.lane.b32.xlu0 %v3638_v11, %s3756_s24 }
 0x56d   :  { %v308_v12 = vpop.permute.xlu0 %307 }
 0x56e   :  { %v4049_v13 = vmul.f32 %v3636_v55, %v308_v12  ;;  %v4172_v55 = vld [vmem:[%s5024_s2 + $0x20] sm:$0xff] }
 0x56f   :  { %450 = vmatpush1.msra.mxu1 %v4172_v55 }
 0x570   :  { %317 = vrot.lane.b32.xlu1 %v4049_v13, %s3755_s18  ;;  %451 = vmatprep.subr.mxu1 %v4178_v56 }
 0x571   :  { %452 = vmatpush1.msra.mxu1 %v4184_v57 }
 0x572   :  { %453 = vmatprep.subr.mxu1 %v4190_v58 }
 0x573   :  { %454 = vmatpush1.msra.mxu1 %v4196_v59 }
 0x574   :  { %3335 = vmatprep.subr.mxu1 %v5030_v1 }
 0x5e2   :  { %v318_v15 = vpop.permute.xlu1 %317 }
 0x5e3   :  { %3311 = vmatmul.mubr.msk.f32.vlgmr.msra.gmra.mxu0 %vm66_vm1, %v318_v15 }
 0x5e4   :  { %3314 = vmatpush3.msra.mxu0 %v4056_v14  ;;  %3321 = vmatprep.mubr.msk.f32.mxu0 %vm3754_vm0, %v5030_v1 }
 0x5e5   :  { %3315 = vmatprep.subr.mxu0 %v5030_v1 }
 0x5e6   :  { %3316 = vmatpush3.msra.mxu0 %v4062_v17 }
 0x5e7   :  { %3317 = vmatprep.subr.mxu0 %v5030_v1 }
 0x5e8   :  { %3318 = vmatpush3.msra.mxu0 %v4071_v18 }
 0x5e9   :  { %3319 = vmatprep.subr.mxu0 %v5030_v1 }
 0x5ea   :  { %3320 = vmatpush3.msra.mxu0 %v4078_v19 }
 0x5eb   :  { %3322 = vmatmul.mubr.msk.f32.vlgmr.msra.gmra.mxu0 %vm66_vm1, %v318_v15  ;;  %3324 = vmatprep.subr.mxu0 %v5030_v1  ;;  %v3051_v15 = vld [vmem:[%s5014_s0 + $0x8] sm:$0xff] }
 0x5ec   :  { %3332 = vmatprep.mubr.msk.f32.mxu0 %vm3754_vm0, %v5030_v1 }
 0x6a3   :  { %v387_v21 = vpop.f32.mrf.mxu0 }
 0x6a4   :  { %v388_v22 = vadd.f32 %v387_v21, %v4090_v20 }
 0x6a5   :  { %v3312_v23 = vpop.f32.mrf.mxu0 }
 0x6a6   :  { %v391_v24 = vsel %vm76_vm2, %v388_v22, -inf  ;;  %v4239_v23 = vld [vmem:[%s5026_s15 + $0x18] sm:$0xff] }
 0x6a7   :  { %392 = vmax.xlane.f32.xlu0 %v391_v24  ;;  %v4244_v24 = vld [vmem:[%s5026_s15 + $0x10] sm:$0xff]  ;;  %3325 = vmatpush3.msra.mxu0 %v4239_v23 }
 0x6a8   :  { %3326 = vmatprep.subr.mxu0 %v5030_v1 }
 0x6a9   :  { %3327 = vmatpush3.msra.mxu0 %v4244_v24 }
 0x6aa   :  { %3328 = vmatprep.subr.mxu0 %v5030_v1 }
 0x6ab   :  { %v4094_v25 = vpop.f32.mrf.mxu0 }
 0x6ad   :  { %v3323_v26 = vpop.f32.mrf.mxu0 }
 0x6ae   :  { %v4253_v26 = vld [vmem:[%s5026_s15 + $0x8] sm:$0xff] }
 0x6af   :  { %3329 = vmatpush3.msra.mxu0 %v4253_v26 }
 0x6b0   :  { %3330 = vmatprep.subr.mxu0 %v5030_v1 }
 0x6bd   :  { %667 = vrot.lane.b32.xlu0 %v4002_v43, %s3756_s24 }
 0x730   :  { %v393_v28 = vpop.xlane.xlu0 %392 }
 0x731   :  { %v394_v29 = vsub.f32 %v388_v22, %v393_v28  ;;  %v4260_v28 = vld [vmem:[%s5026_s15] sm:$0xff] }
 0x732   :  { %3331 = vmatpush3.msra.mxu0 %v4260_v28 }
 0x733   :  { %v395_v37 = vmul.f32 1.442695, %v394_v29  ;;  %3354 = vmatprep.subr.mxu0 %v5030_v1 }
 0x734   :  { %v668_v21 = vpop.permute.xlu0 %667 }
 0x735   :  { %3639 = vpow2.f32 %v395_v37  ;;  %v670_v22 = vsel %vm66_vm1, %v3051_v15, %v668_v21 }
 0x742   :  { %v3640_v41 = vpop.eup %3639 }
 0x743   :  { %v398_v42 = vmul.f32 %v3640_v41, %v4107_v39 }
 0x745   :  { %v399_v43 = vsel %vm76_vm2, %v398_v42, 0.0 }
 0x746   :  { %400 = vadd.xlane.f32.xlu1 %v399_v43 }
 0x7cf   :  { %v401_v60 = vpop.xlane.xlu1 %400 }
 0x7d0   :  { %3641 = vrcp.f32 %v401_v60 }
 0x7dd   :  { %v3642_v11 = vpop.eup %3641 }
 0x7de   :  { %v403_v12 = vmul.f32 %v3642_v11, %v398_v42 }
 0x7e0   :  { %3047 = vmatmul.mubr.msk.f32.vlgmr.msra.gmra.mxu1 %vm76_vm2, %v403_v12 }
 0x7e1   :  { %3336 = vmatpush3.msra.mxu1 %v3854_v2  ;;  %3351 = vmatprep.mubr.msk.f32.mxu1 %vm3754_vm0, %v5030_v1 }
 0x7e2   :  { %3337 = vmatprep.subr.mxu1 %v5030_v1 }
 0x7e3   :  { %3338 = vmatpush3.msra.mxu1 %v3859_v3 }
 0x7e4   :  { %3339 = vmatprep.subr.mxu1 %v5030_v1 }
 0x7e5   :  { %3340 = vmatpush3.msra.mxu1 %v3869_v4 }
 0x7e6   :  { %3341 = vmatprep.subr.mxu1 %v5030_v1 }
 0x7e7   :  { %3342 = vmatpush3.msra.mxu1 %v3882_v6 }
 0x7e8   :  { %3343 = vmatprep.subr.mxu1 %v5030_v1 }
 0x7e9   :  { %3344 = vmatpush3.msra.mxu1 %v3890_v7 }
 0x7ea   :  { %3345 = vmatprep.subr.mxu1 %v5030_v1 }
 0x7eb   :  { %3346 = vmatpush3.msra.mxu1 %v3897_v8 }
 0x7ec   :  { %3347 = vmatprep.subr.mxu1 %v5030_v1 }
 0x7ed   :  { %3348 = vmatpush3.msra.mxu1 %v3904_v9 }
 0x7ee   :  { %3349 = vmatprep.subr.mxu1 %v5030_v1 }
 0x7ef   :  { %3350 = vmatpush3.msra.mxu1 %v3911_v10 }
 0x7f0   :  { %3352 = vmatmul.mubr.msk.f32.vlgmr.msra.gmra.mxu1 %vm76_vm2, %v670_v22  ;;  %3373 = vmatprep.subr.mxu1 %v5030_v1 }
 0x7f1   :  { %3374 = vmatpush3.msra.mxu1 %v4023_v62  ;;  %3381 = vmatprep.mubr.msk.f32.mxu1 %vm3754_vm0, %v5030_v1 }
 0x7f2   :  { %3375 = vmatprep.subr.mxu1 %v5030_v1 }
 0x7f3   :  { %3376 = vmatpush3.msra.mxu1 %v4028_v63 }
 0x7f4   :  { %3377 = vmatprep.subr.mxu1 %v5030_v1 }
 0x7f5   :  { %3378 = vmatpush3.msra.mxu1 %v4035_v0 }
 0x7f6   :  { %3379 = vmatprep.subr.mxu1 %v5030_v1 }
 0x7f7   :  { %3380 = vmatpush3.msra.mxu1 %v4042_v5 }
 0x7f8   :  { %3384 = vmatprep.subr.mxu1 %v5030_v1 }
 0x8a0   :  { %v489_v29 = vpop.f32.mrf.mxu1 }
 0x8a2   :  { %v491_v37 = vpop.f32.mrf.mxu1 }
 0x8a3   :  { %v565_v41 = vadd.f32 %v4094_v25, %v491_v37 }
 0x8a5   :  { %3643 = vtanh.f32 %v565_v41 }
 0x8b0   :  { %v748_v42 = vpop.f32.mrf.mxu1 }
 0x8b1   :  { %v749_v43 = vadd.f32 %v748_v42, %v489_v29 }
 0x8b2   :  { %v3644_v60 = vpop.eup %3643  ;;  %v3353_v11 = vpop.f32.mrf.mxu1 }
 0x8b3   :  { %v759_v12 = vadd.f32 %v3930_v16, %v749_v43  ;;  %3333 = vmatmul.mubr.msk.f32.vlgmr.msra.gmra.mxu0 %vm66_vm1, %v3644_v60 }
 0x8b4   :  { %3355 = vmatpush3.msra.mxu0 %v3941_v31  ;;  %3370 = vmatprep.mubr.msk.f32.mxu0 %vm3754_vm0, %v5030_v1 }
 0x8b5   :  { %3645 = vtanh.f32 %v759_v12  ;;  %3356 = vmatprep.subr.mxu0 %v5030_v1  ;;  %v3054_v15 = vmul.f32 -1.442695, %v759_v12 }
 0x8b6   :  { %3357 = vmatpush3.msra.mxu0 %v3946_v32 }
 0x8b7   :  { %3358 = vmatprep.subr.mxu0 %v5030_v1  ;;  %3647 = vpow2.f32 %v3054_v15 }
 0x8b8   :  { %3359 = vmatpush3.msra.mxu0 %v3953_v33 }
 0x8b9   :  { %3360 = vmatprep.subr.mxu0 %v5030_v1 }
 0x8ba   :  { %3361 = vmatpush3.msra.mxu0 %v3960_v34 }
 0x8bb   :  { %3362 = vmatprep.subr.mxu0 %v5030_v1 }
 0x8bc   :  { %3363 = vmatpush3.msra.mxu0 %v3967_v35 }
 0x8bd   :  { %3364 = vmatprep.subr.mxu0 %v5030_v1 }
 0x8be   :  { %3365 = vmatpush3.msra.mxu0 %v3974_v36 }
 0x8bf   :  { %3366 = vmatprep.subr.mxu0 %v5030_v1 }
 0x8c0   :  { %3367 = vmatpush3.msra.mxu0 %v3982_v38 }
 0x8c1   :  { %3368 = vmatprep.subr.mxu0 %v5030_v1 }
 0x8c2   :  { %v3646_v25 = vpop.eup %3645  ;;  %3369 = vmatpush3.msra.mxu0 %v3995_v40 }
 0x8c3   :  { %769 = vrot.lane.b32.xlu1 %v3646_v25, %s3756_s24  ;;  %1032 = vmatprep.subr.mxu0 %v4101_v27 }
 0x8c4   :  { %v3648_v21 = vpop.eup %3647 }
 0x8c5   :  { %v763_v22 = vadd.f32 1.0, %v3648_v21 }
 0x8c7   :  { %3649 = vrcp.f32 %v763_v22 }
 0x8d4   :  { %v3650_v29 = vpop.eup %3649 }
 0x8d5   :  { %v767_v60 = vmul.f32 %v3650_v29, %v3935_v30 }
 0x935   :  { %v770_v37 = vpop.permute.xlu1 %769 }
 0x936   :  { %v772_v41 = vmul.f32 %v3650_v29, %v770_v37  ;;  %v5041_v37 = vmov 0.0  }
 0x938   :  { %774 = vrot.lane.b32.xlu0 %v772_v41, %s3755_s18 }
 0x973   :  { %v4287_v42 = vpop.f32.mrf.mxu0 }
 0x974   :  { %5040 = vst [vmem:[#allocation4_spill] sm:$0xff] %v4287_v42 }
 0x975   :  { %v3334_v43 = vpop.f32.mrf.mxu0 }
 0x9aa   :  { %v775_v11 = vpop.permute.xlu0 %774 }
 0x9ab   :  { %v4290_v1 = vadd.f32 %v775_v11, %v767_v60 }
 0x9ad   :  { %3651 = vtanh.f32 %v4290_v1 }
 0x9ba   :  { %v3652_v12 = vpop.eup %3651 }
 0x9bb   :  { %780 = vrot.lane.b32.xlu1 %v3652_v12, %s3756_s24 }
 0x9bf   :  { %788 = vrot.lane.b32.xlu1 %v4049_v13, %s3756_s24 }
 0xa2d   :  { %v781_v25 = vpop.permute.xlu1 %780 }
 0xa2e   :  { %v4296_v15 = vmul.f32 %v3650_v29, %v781_v25 }
 0xa30   :  { %785 = vrot.lane.b32.xlu0 %v4296_v15, %s3755_s18 }
 0xa31   :  { %v789_v21 = vpop.permute.xlu1 %788 }
 0xaa2   :  { %v786_v22 = vpop.permute.xlu0 %785 }
 0xaa3   :  { %v791_v30 = vsel %vm66_vm1, %v786_v22, %v789_v21 }
 0xaa4   :  { %3371 = vmatmul.mubr.msk.f32.vlgmr.msra.gmra.mxu0 %vm76_vm2, %v791_v30 }
 0xaa5   :  { %1033 = vmatpush1.msra.mxu0 %v4114_v44  ;;  %1080 = vmatprep.mubr.f32.mxu0 %v5041_v37 }
 0xaa6   :  { %1034 = vmatprep.subr.mxu0 %v4119_v45 }
 0xaa7   :  { %1035 = vmatpush1.msra.mxu0 %v4124_v46 }
 0xaa8   :  { %1036 = vmatprep.subr.mxu0 %v4130_v48 }
 0xaa9   :  { %1037 = vmatpush1.msra.mxu0 %v4136_v49 }
 0xaaa   :  { %1038 = vmatprep.subr.mxu0 %v4142_v50 }
 0xaab   :  { %1039 = vmatpush1.msra.mxu0 %v4148_v51 }
 0xaac   :  { %1040 = vmatprep.subr.mxu0 %v4154_v52 }
 0xaad   :  { %1041 = vmatpush1.msra.mxu0 %v4160_v53 }
 0xaae   :  { %1042 = vmatprep.subr.mxu0 %v4166_v54 }
 0xaaf   :  { %1043 = vmatpush1.msra.mxu0 %v4172_v55 }
 0xab0   :  { %1044 = vmatprep.subr.mxu0 %v4178_v56 }
 0xab1   :  { %1045 = vmatpush1.msra.mxu0 %v4184_v57 }
 0xab2   :  { %1046 = vmatprep.subr.mxu0 %v4190_v58 }
 0xab3   :  { %1047 = vmatpush1.msra.mxu0 %v4196_v59 }
 0xab4   :  { %3406 = vmatprep.subr.mxu0 %v5041_v37 }
 0xb64   :  { %v876_v13 = vpop.f32.mrf.mxu0 }
 0xb65   :  { %v877_v29 = vadd.f32 %v4012_v47, %v876_v13 }
 0xb66   :  { %v3372_v41 = vpop.f32.mrf.mxu0 }
 0xb67   :  { %3653 = vtanh.f32 %v877_v29  ;;  %v3057_v60 = vmul.f32 -1.442695, %v877_v29 }
 0xb69   :  { %3655 = vpow2.f32 %v3057_v60 }
 0xb74   :  { %v3654_v43 = vpop.eup %3653 }
 0xb75   :  { %889 = vrot.lane.b32.xlu0 %v3654_v43, %s3756_s24 }
 0xb76   :  { %v3656_v11 = vpop.eup %3655 }
 0xb77   :  { %v883_v12 = vadd.f32 1.0, %v3656_v11 }
 0xb79   :  { %3657 = vrcp.f32 %v883_v12 }
 0xb86   :  { %v3658_v25 = vpop.eup %3657 }
 0xb87   :  { %v887_v30 = vmul.f32 %v3658_v25, %v4017_v61 }
 0xbe7   :  { %v890_v21 = vpop.permute.xlu0 %889 }
 0xbe8   :  { %v892_v22 = vmul.f32 %v3658_v25, %v890_v21 }
 0xbea   :  { %894 = vrot.lane.b32.xlu1 %v892_v22, %s3755_s18 }
 0xc5c   :  { %v895_v42 = vpop.permute.xlu1 %894 }
 0xc5d   :  { %v4323_v59 = vadd.f32 %v895_v42, %v887_v30 }
 0xc5f   :  { %3659 = vtanh.f32 %v4323_v59 }
 0xc6c   :  { %v3660_v13 = vpop.eup %3659 }
 0xc6d   :  { %900 = vrot.lane.b32.xlu0 %v3660_v13, %s3756_s24 }
 0xcdf   :  { %v901_v29 = vpop.permute.xlu0 %900 }
 0xce0   :  { %v4327_v41 = vmul.f32 %v3658_v25, %v901_v29 }
 0xce2   :  { %910 = vrot.lane.b32.xlu1 %v4327_v41, %s3755_s18 }
 0xd54   :  { %v911_v43 = vpop.permute.xlu1 %910 }
 0xd55   :  { %3382 = vmatmul.mubr.msk.f32.vlgmr.msra.gmra.mxu1 %vm66_vm1, %v911_v43 }
 0xd56   :  { %3385 = vmatpush3.msra.mxu1 %v4056_v14  ;;  %3392 = vmatprep.mubr.msk.f32.mxu1 %vm3754_vm0, %v5041_v37 }
 0xd57   :  { %3386 = vmatprep.subr.mxu1 %v5041_v37 }
 0xd58   :  { %3387 = vmatpush3.msra.mxu1 %v4062_v17 }
 0xd59   :  { %3388 = vmatprep.subr.mxu1 %v5041_v37 }
 0xd5a   :  { %3389 = vmatpush3.msra.mxu1 %v4071_v18 }
 0xd5b   :  { %3390 = vmatprep.subr.mxu1 %v5041_v37 }
 0xd5c   :  { %3391 = vmatpush3.msra.mxu1 %v4078_v19 }
 0xd5d   :  { %3393 = vmatmul.mubr.msk.f32.vlgmr.msra.gmra.mxu1 %vm66_vm1, %v911_v43  ;;  %3395 = vmatprep.subr.mxu1 %v5041_v37 }
 0xd5e   :  { %3396 = vmatpush3.msra.mxu1 %v4239_v23  ;;  %3403 = vmatprep.mubr.msk.f32.mxu1 %vm3754_vm0, %v5041_v37 }
 0xd5f   :  { %3397 = vmatprep.subr.mxu1 %v5041_v37 }
 0xd60   :  { %3398 = vmatpush3.msra.mxu1 %v4244_v24 }
 0xd61   :  { %3399 = vmatprep.subr.mxu1 %v5041_v37 }
 0xd62   :  { %3400 = vmatpush3.msra.mxu1 %v4253_v26 }
 0xd63   :  { %3401 = vmatprep.subr.mxu1 %v5041_v37 }
 0xd64   :  { %3402 = vmatpush3.msra.mxu1 %v4260_v28 }
 0xd65   :  { %3425 = vmatprep.subr.mxu1 %v5041_v37 }
 0xe15   :  { %v980_v61 = vpop.f32.mrf.mxu1 }
 0xe16   :  { %v981_v42 = vadd.f32 %v980_v61, %v4090_v20 }
 0xe17   :  { %v3383_v60 = vpop.f32.mrf.mxu1 }
 0xe18   :  { %v984_v11 = vsel %vm76_vm2, %v981_v42, -inf }
 0xe19   :  { %985 = vmax.xlane.f32.xlu0 %v984_v11 }
 0xe1d   :  { %v1157_v12 = vpop.f32.mrf.mxu1 }
 0xe1f   :  { %v3394_v25 = vpop.f32.mrf.mxu1 }
 0xe2f   :  { %1260 = vrot.lane.b32.xlu0 %v4296_v15, %s3756_s24 }
 0xea2   :  { %v986_v21 = vpop.xlane.xlu0 %985 }
 0xea3   :  { %v987_v22 = vsub.f32 %v981_v42, %v986_v21 }
 0xea5   :  { %v988_v30 = vmul.f32 1.442695, %v987_v22 }
 0xea7   :  { %3661 = vpow2.f32 %v988_v30 }
 0xeb4   :  { %v3662_v13 = vpop.eup %3661 }
 0xeb5   :  { %v991_v29 = vmul.f32 %v3662_v13, %v4107_v39 }
 0xeb7   :  { %v992_v43 = vsel %vm76_vm2, %v991_v29, 0.0 }
 0xeb8   :  { %993 = vadd.xlane.f32.xlu1 %v992_v43 }
 0xf41   :  { %v994_v61 = vpop.xlane.xlu1 %993 }
 0xf42   :  { %3663 = vrcp.f32 %v994_v61 }
 0xf4f   :  { %v3664_v60 = vpop.eup %3663 }
 0xf50   :  { %v996_v20 = vmul.f32 %v3664_v60, %v991_v29 }
 0xf52   :  { %3059 = vmatmul.mubr.msk.f32.vlgmr.msra.gmra.mxu0 %vm76_vm2, %v996_v20 }
 0xf53   :  { %3407 = vmatpush3.msra.mxu0 %v3854_v2  ;;  %3422 = vmatprep.mubr.msk.f32.mxu0 %vm3754_vm0, %v5041_v37  ;;  %v3063_v2 = vld [vmem:[%s5014_s0 + $0x10] sm:$0xff] }
 0xf54   :  { %3408 = vmatprep.subr.mxu0 %v5041_v37 }
 0xf55   :  { %3409 = vmatpush3.msra.mxu0 %v3859_v3  ;;  %v1261_v3 = vpop.permute.xlu0 %1260 }
 0xf56   :  { %3410 = vmatprep.subr.mxu0 %v5041_v37 }
 0xf57   :  { %3411 = vmatpush3.msra.mxu0 %v3869_v4  ;;  %v1263_v4 = vsel %vm66_vm1, %v3063_v2, %v1261_v3  ;;  %v4490_v3 = vld [vmem:[%s5037_s29 + $0x38] sm:$0xff] }
 0xf58   :  { %3412 = vmatprep.subr.mxu0 %v5041_v37 }
 0xf59   :  { %3413 = vmatpush3.msra.mxu0 %v3882_v6 }
 0xf5a   :  { %3414 = vmatprep.subr.mxu0 %v5041_v37 }
 0xf5b   :  { %3415 = vmatpush3.msra.mxu0 %v3890_v7 }
 0xf5c   :  { %3416 = vmatprep.subr.mxu0 %v5041_v37 }
 0xf5d   :  { %3417 = vmatpush3.msra.mxu0 %v3897_v8 }
 0xf5e   :  { %3418 = vmatprep.subr.mxu0 %v5041_v37 }
 0xf5f   :  { %3419 = vmatpush3.msra.mxu0 %v3904_v9 }
 0xf60   :  { %3420 = vmatprep.subr.mxu0 %v5041_v37 }
 0xf61   :  { %3421 = vmatpush3.msra.mxu0 %v3911_v10 }
 0xf62   :  { %3423 = vmatmul.mubr.msk.f32.vlgmr.msra.gmra.mxu0 %vm76_vm2, %v1263_v4  ;;  %3444 = vmatprep.subr.mxu0 %v5041_v37  ;;  %v4496_v4 = vld [vmem:[%s5037_s29 + $0x30] sm:$0xff] }
 0xf63   :  { %3445 = vmatpush3.msra.mxu0 %v4023_v62  ;;  %3452 = vmatprep.mubr.msk.f32.mxu0 %vm3754_vm0, %v5041_v37 }
 0xf64   :  { %3446 = vmatprep.subr.mxu0 %v5041_v37 }
 0xf65   :  { %3447 = vmatpush3.msra.mxu0 %v4028_v63 }
 0xf66   :  { %3448 = vmatprep.subr.mxu0 %v5041_v37 }
 0xf67   :  { %3449 = vmatpush3.msra.mxu0 %v4035_v0 }
 0xf68   :  { %3450 = vmatprep.subr.mxu0 %v5041_v37 }
 0xf69   :  { %3451 = vmatpush3.msra.mxu0 %v4042_v5 }
 0xf6a   :  { %3455 = vmatprep.subr.mxu0 %v5041_v37 }
0x1012   :  { %v1082_v6 = vpop.f32.mrf.mxu0 }
0x1014   :  { %v1084_v7 = vpop.f32.mrf.mxu0 }
0x1015   :  { %v1158_v8 = vadd.f32 %v1157_v12, %v1084_v7  ;;  %v4519_v7 = vld [vmem:[%s5037_s29 + $0x18] sm:$0xff] }
0x1017   :  { %3665 = vtanh.f32 %v1158_v8  ;;  %v4526_v8 = vld [vmem:[%s5037_s29 + $0x10] sm:$0xff] }
0x1022   :  { %v1341_v9 = vpop.f32.mrf.mxu0 }
0x1023   :  { %v1342_v10 = vadd.f32 %v1341_v9, %v1082_v6  ;;  %v4512_v6 = vld [vmem:[%s5037_s29 + $0x20] sm:$0xff]  ;;  %v4533_v9 = vld [vmem:[%s5037_s29 + $0x8] sm:$0xff] }
0x1024   :  { %v3666_v62 = vpop.eup %3665  ;;  %v3424_v20 = vpop.f32.mrf.mxu0 }
0x1025   :  { %v1352_v63 = vadd.f32 %v3930_v16, %v1342_v10  ;;  %3404 = vmatmul.mubr.msk.f32.vlgmr.msra.gmra.mxu1 %vm66_vm1, %v3666_v62  ;;  %v3075_v10 = vld [vmem:[%s5014_s0 + $0x18] sm:$0xff]  ;;  %v4543_v20 = vld [vmem:[%s5037_s29] sm:$0xff] }
0x1026   :  { %3426 = vmatpush3.msra.mxu1 %v3941_v31  ;;  %3441 = vmatprep.mubr.msk.f32.mxu1 %vm3754_vm0, %v5041_v37 }
0x1027   :  { %3667 = vtanh.f32 %v1352_v63  ;;  %3427 = vmatprep.subr.mxu1 %v5041_v37  ;;  %v3066_v31 = vmul.f32 -1.442695, %v1352_v63 }
0x1028   :  { %3428 = vmatpush3.msra.mxu1 %v3946_v32 }
0x1029   :  { %3429 = vmatprep.subr.mxu1 %v5041_v37  ;;  %3669 = vpow2.f32 %v3066_v31 }
0x102a   :  { %3430 = vmatpush3.msra.mxu1 %v3953_v33 }
0x102b   :  { %3431 = vmatprep.subr.mxu1 %v5041_v37 }
0x102c   :  { %3432 = vmatpush3.msra.mxu1 %v3960_v34 }
0x102d   :  { %3433 = vmatprep.subr.mxu1 %v5041_v37 }
0x102e   :  { %3434 = vmatpush3.msra.mxu1 %v3967_v35 }
0x102f   :  { %3435 = vmatprep.subr.mxu1 %v5041_v37 }
0x1030   :  { %3436 = vmatpush3.msra.mxu1 %v3974_v36 }
0x1031   :  { %3437 = vmatprep.subr.mxu1 %v5041_v37 }
0x1032   :  { %3438 = vmatpush3.msra.mxu1 %v3982_v38 }
0x1033   :  { %3439 = vmatprep.subr.mxu1 %v5041_v37 }
0x1034   :  { %v3668_v16 = vpop.eup %3667  ;;  %3440 = vmatpush3.msra.mxu1 %v3995_v40 }
0x1035   :  { %1362 = vrot.lane.b32.xlu1 %v3668_v16, %s3756_s24  ;;  %1625 = vmatprep.subr.mxu1 %v4101_v27 }
0x1036   :  { %v3670_v32 = vpop.eup %3669 }
0x1037   :  { %v1356_v33 = vadd.f32 1.0, %v3670_v32 }
0x1039   :  { %3671 = vrcp.f32 %v1356_v33 }
0x1046   :  { %v3672_v34 = vpop.eup %3671 }
0x1047   :  { %v1360_v5 = vmul.f32 %v3672_v34, %v4290_v1 }
0x10a7   :  { %v1363_v35 = vpop.permute.xlu1 %1362 }
0x10a8   :  { %v1365_v36 = vmul.f32 %v3672_v34, %v1363_v35 }
0x10aa   :  { %1367 = vrot.lane.b32.xlu0 %v1365_v36, %s3755_s18 }
0x10e5   :  { %v4415_v38 = vpop.f32.mrf.mxu1 }
0x10e7   :  { %v3405_v0 = vpop.f32.mrf.mxu1 }
0x111c   :  { %v1368_v40 = vpop.permute.xlu0 %1367 }
0x111d   :  { %v4418_v15 = vadd.f32 %v1368_v40, %v1360_v5 }
0x111f   :  { %3673 = vtanh.f32 %v4418_v15 }
0x112c   :  { %v3674_v27 = vpop.eup %3673 }
0x112d   :  { %1373 = vrot.lane.b32.xlu1 %v3674_v27, %s3756_s24 }
0x1131   :  { %1381 = vrot.lane.b32.xlu1 %v4327_v41, %s3756_s24 }
0x119f   :  { %v1374_v42 = vpop.permute.xlu1 %1373 }
0x11a0   :  { %v4424_v11 = vmul.f32 %v3672_v34, %v1374_v42  ;;  %v4556_v34 = vld [vmem:[%s5016_s11] ss:$0 sm:$0xff] }
0x11a2   :  { %1378 = vrot.lane.b32.xlu0 %v4424_v11, %s3755_s18 }
0x11a3   :  { %v1382_v12 = vpop.permute.xlu1 %1381 }
0x1214   :  { %v1379_v25 = vpop.permute.xlu0 %1378 }
0x1215   :  { %v1384_v1 = vsel %vm66_vm1, %v1379_v25, %v1382_v12 }
0x1216   :  { %3442 = vmatmul.mubr.msk.f32.vlgmr.msra.gmra.mxu1 %vm76_vm2, %v1384_v1 }
0x1217   :  { %1626 = vmatpush1.msra.mxu1 %v4114_v44  ;;  %1673 = vmatprep.mubr.f32.mxu1 %v5041_v37  ;;  %v5042_v44 = vld [vmem:[#allocation3_spill] sm:$0xff] }
0x1218   :  { %1627 = vmatprep.subr.mxu1 %v4119_v45 }
0x1219   :  { %1628 = vmatpush1.msra.mxu1 %v4124_v46 }
0x121a   :  { %1629 = vmatprep.subr.mxu1 %v4130_v48 }
0x121b   :  { %1630 = vmatpush1.msra.mxu1 %v4136_v49 }
0x121c   :  { %1631 = vmatprep.subr.mxu1 %v4142_v50 }
0x121d   :  { %1632 = vmatpush1.msra.mxu1 %v4148_v51 }
0x121e   :  { %1633 = vmatprep.subr.mxu1 %v4154_v52 }
0x121f   :  { %1634 = vmatpush1.msra.mxu1 %v4160_v53 }
0x1220   :  { %1635 = vmatprep.subr.mxu1 %v4166_v54 }
0x1221   :  { %1636 = vmatpush1.msra.mxu1 %v4172_v55 }
0x1222   :  { %1637 = vmatprep.subr.mxu1 %v4178_v56 }
0x1223   :  { %1638 = vmatpush1.msra.mxu1 %v4184_v57 }
0x1224   :  { %1639 = vmatprep.subr.mxu1 %v4190_v58 }
0x1225   :  { %1640 = vmatpush1.msra.mxu1 %v5042_v44 }
0x1226   :  { %3477 = vmatprep.subr.mxu1 %v5041_v37 }
0x12d6   :  { %v1469_v45 = vpop.f32.mrf.mxu1 }
0x12d7   :  { %v1470_v46 = vadd.f32 %v4012_v47, %v1469_v45 }
0x12d8   :  { %v3443_v48 = vpop.f32.mrf.mxu1 }
0x12d9   :  { %3675 = vtanh.f32 %v1470_v46  ;;  %v3069_v50 = vmul.f32 -1.442695, %v1470_v46 }
0x12db   :  { %3677 = vpow2.f32 %v3069_v50  ;;  %v4573_v50 = vld [vmem:[%s5017_s12 + $0x38] sm:$0xff] }
0x12e6   :  { %v3676_v49 = vpop.eup %3675 }
0x12e7   :  { %1482 = vrot.lane.b32.xlu0 %v3676_v49, %s3756_s24 }
0x12e8   :  { %v3678_v51 = vpop.eup %3677 }
0x12e9   :  { %v1476_v52 = vadd.f32 1.0, %v3678_v51  ;;  %v4578_v51 = vld [vmem:[%s5017_s12 + $0x30] sm:$0xff] }
0x12eb   :  { %3679 = vrcp.f32 %v1476_v52  ;;  %v4592_v52 = vld [vmem:[%s5017_s12 + $0x20] sm:$0xff] }
0x12f8   :  { %v3680_v53 = vpop.eup %3679 }
0x12f9   :  { %v1480_v56 = vmul.f32 %v3680_v53, %v4323_v59 }
0x1359   :  { %v1483_v54 = vpop.permute.xlu0 %1482 }
0x135a   :  { %v1485_v55 = vmul.f32 %v3680_v53, %v1483_v54  ;;  %v4606_v54 = vld [vmem:[%s5017_s12 + $0x10] sm:$0xff] }
0x135c   :  { %1487 = vrot.lane.b32.xlu1 %v1485_v55, %s3755_s18 }
0x13ce   :  { %v1488_v57 = vpop.permute.xlu1 %1487 }
0x13cf   :  { %v4451_v58 = vadd.f32 %v1488_v57, %v1480_v56  ;;  %v4614_v56 = vld [vmem:[%s5017_s12 + $0x8] sm:$0xff]  ;;  %v4625_v57 = vld [vmem:[%s5017_s12] sm:$0xff] }
0x13d1   :  { %3681 = vtanh.f32 %v4451_v58 }
0x13de   :  { %v3682_v47 = vpop.eup %3681 }
0x13df   :  { %1493 = vrot.lane.b32.xlu0 %v3682_v47, %s3756_s24 }
0x1451   :  { %v1494_v41 = vpop.permute.xlu0 %1493 }
0x1452   :  { %v4455_v21 = vmul.f32 %v3680_v53, %v1494_v41  ;;  %v4599_v53 = vld [vmem:[%s5017_s12 + $0x18] sm:$0xff] }
0x1454   :  { %1503 = vrot.lane.b32.xlu1 %v4455_v21, %s3755_s18 }
0x14c6   :  { %v1504_v22 = vpop.permute.xlu1 %1503 }
0x14c7   :  { %3453 = vmatmul.mubr.msk.f32.vlgmr.msra.gmra.mxu0 %vm66_vm1, %v1504_v22 }
0x14c8   :  { %3456 = vmatpush3.msra.mxu0 %v4056_v14  ;;  %3463 = vmatprep.mubr.msk.f32.mxu0 %vm3754_vm0, %v5041_v37 }
0x14c9   :  { %3457 = vmatprep.subr.mxu0 %v5041_v37 }
0x14ca   :  { %3458 = vmatpush3.msra.mxu0 %v4062_v17  ;;  %v5043_v17 = vld [vmem:[#allocation2_spill] sm:$0xff] }
0x14cb   :  { %3459 = vmatprep.subr.mxu0 %v5041_v37 }
0x14cc   :  { %3460 = vmatpush3.msra.mxu0 %v4071_v18 }
0x14cd   :  { %3461 = vmatprep.subr.mxu0 %v5041_v37 }
0x14ce   :  { %3462 = vmatpush3.msra.mxu0 %v4078_v19 }
0x14cf   :  { %3464 = vmatmul.mubr.msk.f32.vlgmr.msra.gmra.mxu0 %vm66_vm1, %v1504_v22  ;;  %3466 = vmatprep.subr.mxu0 %v5041_v37 }
0x14d0   :  { %3467 = vmatpush3.msra.mxu0 %v4239_v23  ;;  %3474 = vmatprep.mubr.msk.f32.mxu0 %vm3754_vm0, %v5041_v37 }
0x14d1   :  { %3468 = vmatprep.subr.mxu0 %v5041_v37 }
0x14d2   :  { %3469 = vmatpush3.msra.mxu0 %v4244_v24 }
0x14d3   :  { %3470 = vmatprep.subr.mxu0 %v5041_v37 }
0x14d4   :  { %3471 = vmatpush3.msra.mxu0 %v4253_v26 }
0x14d5   :  { %3472 = vmatprep.subr.mxu0 %v5041_v37 }
0x14d6   :  { %3473 = vmatpush3.msra.mxu0 %v4260_v28 }
0x14d7   :  { %3496 = vmatprep.subr.mxu0 %v5041_v37 }
0x1587   :  { %v1573_v14 = vpop.f32.mrf.mxu0 }
0x1588   :  { %v1574_v18 = vadd.f32 %v1573_v14, %v5043_v17 }
0x1589   :  { %v3454_v19 = vpop.f32.mrf.mxu0 }
0x158a   :  { %v1577_v59 = vsel %vm76_vm2, %v1574_v18, -inf }
0x158b   :  { %1578 = vmax.xlane.f32.xlu0 %v1577_v59 }
0x158f   :  { %v1750_v23 = vpop.f32.mrf.mxu0 }
0x1591   :  { %v3465_v30 = vpop.f32.mrf.mxu0 }
0x15a1   :  { %1853 = vrot.lane.b32.xlu0 %v4424_v11, %s3756_s24 }
0x1614   :  { %v1579_v24 = vpop.xlane.xlu0 %1578 }
0x1615   :  { %v1580_v26 = vsub.f32 %v1574_v18, %v1579_v24 }
0x1617   :  { %v1581_v13 = vmul.f32 1.442695, %v1580_v26 }
0x1618   :  { %v1854_v62 = vpop.permute.xlu0 %1853 }
0x1619   :  { %3683 = vpow2.f32 %v1581_v13  ;;  %v1856_v63 = vsel %vm66_vm1, %v3075_v10, %v1854_v62  ;;  %v4655_v10 = vld [vmem:[%s5021_s1 + $0x10] sm:$0xff]  ;;  %v4669_v62 = vld [vmem:[%s5021_s1] sm:$0xff] }
0x1626   :  { %v3684_v29 = vpop.eup %3683 }
0x1627   :  { %v1584_v28 = vmul.f32 %v3684_v29, %v4107_v39  ;;  %v4505_v39 = vld [vmem:[%s5037_s29 + $0x28] sm:$0xff] }
0x1629   :  { %v1585_v43 = vsel %vm76_vm2, %v1584_v28, 0.0 }
0x162a   :  { %1586 = vadd.xlane.f32.xlu1 %v1585_v43 }
0x16b3   :  { %v1587_v61 = vpop.xlane.xlu1 %1586 }
0x16b4   :  { %3685 = vrcp.f32 %v1587_v61 }
0x16c1   :  { %v3686_v60 = vpop.eup %3685 }
0x16c2   :  { %v1589_v2 = vmul.f32 %v3686_v60, %v1584_v28 }
0x16c4   :  { %3071 = vmatmul.mubr.msk.f32.vlgmr.msra.gmra.mxu1 %vm76_vm2, %v1589_v2  ;;  %v4650_v2 = vld [vmem:[%s5021_s1 + $0x18] sm:$0xff] }
0x16c5   :  { %3478 = vmatpush3.msra.mxu1 %v4490_v3  ;;  %3493 = vmatprep.mubr.msk.f32.mxu1 %vm3754_vm0, %v5041_v37 }
0x16c6   :  { %3479 = vmatprep.subr.mxu1 %v5041_v37 }
0x16c7   :  { %3480 = vmatpush3.msra.mxu1 %v4496_v4 }
0x16c8   :  { %3481 = vmatprep.subr.mxu1 %v5041_v37 }
0x16c9   :  { %3482 = vmatpush3.msra.mxu1 %v4505_v39 }
0x16ca   :  { %3483 = vmatprep.subr.mxu1 %v5041_v37 }
0x16cb   :  { %3484 = vmatpush3.msra.mxu1 %v4512_v6 }
0x16cc   :  { %3485 = vmatprep.subr.mxu1 %v5041_v37 }
0x16cd   :  { %3486 = vmatpush3.msra.mxu1 %v4519_v7 }
0x16ce   :  { %3487 = vmatprep.subr.mxu1 %v5041_v37 }
0x16cf   :  { %3488 = vmatpush3.msra.mxu1 %v4526_v8 }
0x16d0   :  { %3489 = vmatprep.subr.mxu1 %v5041_v37 }
0x16d1   :  { %3490 = vmatpush3.msra.mxu1 %v4533_v9 }
0x16d2   :  { %3491 = vmatprep.subr.mxu1 %v5041_v37 }
0x16d3   :  { %3492 = vmatpush3.msra.mxu1 %v4543_v20 }
0x16d4   :  { %3494 = vmatmul.mubr.msk.f32.vlgmr.msra.gmra.mxu1 %vm76_vm2, %v1856_v63  ;;  %3515 = vmatprep.subr.mxu1 %v5041_v37 }
0x16d5   :  { %3523 = vmatprep.mubr.msk.f32.mxu1 %vm3754_vm0, %v5041_v37  ;;  %3516 = vmatpush3.msra.mxu1 %v4650_v2 }
0x16d6   :  { %3517 = vmatprep.subr.mxu1 %v5041_v37 }
0x16d7   :  { %3518 = vmatpush3.msra.mxu1 %v4655_v10 }
0x16d8   :  { %3519 = vmatprep.subr.mxu1 %v5041_v37 }
0x1784   :  { %v1675_v16 = vpop.f32.mrf.mxu1 }
0x1786   :  { %v1677_v31 = vpop.f32.mrf.mxu1 }
0x1787   :  { %v1751_v32 = vadd.f32 %v1750_v23, %v1677_v31 }
0x1789   :  { %3687 = vtanh.f32 %v1751_v32  ;;  %v4683_v32 = vld [vmem:[%s5022_s14 + $0x18] sm:$0xff] }
0x1794   :  { %v1934_v33 = vpop.f32.mrf.mxu1 }
0x1795   :  { %v1935_v35 = vadd.f32 %v1934_v33, %v1675_v16 }
0x1796   :  { %v3688_v36 = vpop.eup %3687  ;;  %v3495_v0 = vpop.f32.mrf.mxu1 }
0x1797   :  { %v1945_v5 = vadd.f32 %v4556_v34, %v1935_v35  ;;  %3475 = vmatmul.mubr.msk.f32.vlgmr.msra.gmra.mxu0 %vm66_vm1, %v3688_v36  ;;  %v4689_v35 = vld [vmem:[%s5022_s14 + $0x10] sm:$0xff]  ;;  %v4698_v36 = vld [vmem:[%s5022_s14 + $0x8] sm:$0xff]  ;;  %v4705_v0 = vld [vmem:[%s5022_s14] sm:$0xff] }
0x1798   :  { %3512 = vmatprep.mubr.msk.f32.mxu0 %vm3754_vm0, %v5041_v37  ;;  %3497 = vmatpush3.msra.mxu0 %v4573_v50 }
0x1799   :  { %3689 = vtanh.f32 %v1945_v5  ;;  %v3078_v27 = vmul.f32 -1.442695, %v1945_v5  ;;  %3498 = vmatprep.subr.mxu0 %v5041_v37  ;;  %v4717_v5 = vld [vmem:[%s5023_s4] sm:$0xff] }
0x179a   :  { %3499 = vmatpush3.msra.mxu0 %v4578_v51 }
0x179b   :  { %3691 = vpow2.f32 %v3078_v27  ;;  %3500 = vmatprep.subr.mxu0 %v5041_v37 }
0x17a6   :  { %v3690_v40 = vpop.eup %3689 }
0x17a7   :  { %1955 = vrot.lane.b32.xlu1 %v3690_v40, %s3756_s24 }
0x17a8   :  { %v3692_v42 = vpop.eup %3691 }
0x17a9   :  { %v1949_v11 = vadd.f32 1.0, %v3692_v42 }
0x17ab   :  { %3693 = vrcp.f32 %v1949_v11 }
0x17b8   :  { %v3694_v12 = vpop.eup %3693 }
0x17b9   :  { %v1953_v46 = vmul.f32 %v3694_v12, %v4418_v15  ;;  %v4585_v15 = vld [vmem:[%s5017_s12 + $0x28] sm:$0xff] }
0x17ba   :  { %3501 = vmatpush3.msra.mxu0 %v4585_v15 }
0x17bb   :  { %3502 = vmatprep.subr.mxu0 %v5041_v37 }
0x17bc   :  { %3503 = vmatpush3.msra.mxu0 %v4592_v52 }
0x17bd   :  { %3504 = vmatprep.subr.mxu0 %v5041_v37 }
0x17be   :  { %3505 = vmatpush3.msra.mxu0 %v4599_v53 }
0x17bf   :  { %3506 = vmatprep.subr.mxu0 %v5041_v37 }
0x17c0   :  { %3507 = vmatpush3.msra.mxu0 %v4606_v54 }
0x17c1   :  { %3508 = vmatprep.subr.mxu0 %v5041_v37 }
0x17c2   :  { %3509 = vmatpush3.msra.mxu0 %v4614_v56 }
0x17c3   :  { %3510 = vmatprep.subr.mxu0 %v5041_v37 }
0x17c4   :  { %3511 = vmatpush3.msra.mxu0 %v4625_v57 }
0x1819   :  { %v1956_v25 = vpop.permute.xlu1 %1955 }
0x181a   :  { %v1958_v1 = vmul.f32 %v3694_v12, %v1956_v25 }
0x181c   :  { %1960 = vrot.lane.b32.xlu0 %v1958_v1, %s3755_s18  ;;  %v4728_v1 = vld [vmem:[%s5024_s2 + $0x78] sm:$0xff] }
0x181d   :  { %2218 = vmatprep.subr.mxu0 %v4728_v1 }
0x1857   :  { %v4564_v44 = vpop.f32.mrf.mxu0 }
0x1859   :  { %v3476_v45 = vpop.f32.mrf.mxu0 }
0x188e   :  { %v1961_v48 = vpop.permute.xlu0 %1960 }
0x188f   :  { %v4567_v49 = vadd.f32 %v1961_v48, %v1953_v46 }
0x1891   :  { %3695 = vtanh.f32 %v4567_v49 }
0x189e   :  { %v3696_v55 = vpop.eup %3695 }
0x189f   :  { %1966 = vrot.lane.b32.xlu1 %v3696_v55, %s3756_s24  ;;  %v4734_v55 = vld [vmem:[%s5025_s3] sm:$0xff] }
0x18a3   :  { %1974 = vrot.lane.b32.xlu1 %v4455_v21, %s3756_s24  ;;  %v4638_v21 = vld [vmem:[%s5020_s13] ss:$0 sm:$0xff] }
0x1911   :  { %v1967_v47 = vpop.permute.xlu1 %1966 }
0x1912   :  { %v4628_v41 = vmul.f32 %v3694_v12, %v1967_v47 }
0x1914   :  { %1971 = vrot.lane.b32.xlu0 %v4628_v41, %s3755_s18 }
0x1915   :  { %v1975_v22 = vpop.permute.xlu1 %1974 }
0x1986   :  { %v1972_v14 = vpop.permute.xlu0 %1971 }
0x1987   :  { %v1977_v17 = vsel %vm66_vm1, %v1972_v14, %v1975_v22  ;;  %v4741_v14 = vld [vmem:[%s5024_s2 + $0x70] sm:$0xff] }
0x1988   :  { %3513 = vmatmul.mubr.msk.f32.vlgmr.msra.gmra.mxu0 %vm76_vm2, %v1977_v17  ;;  %v4746_v17 = vld [vmem:[%s5024_s2 + $0x68] sm:$0xff] }
0x1989   :  { %2266 = vmatprep.mubr.f32.mxu0 %v5041_v37  ;;  %2219 = vmatpush1.msra.mxu0 %v4741_v14 }
0x198a   :  { %2220 = vmatprep.subr.mxu0 %v4746_v17 }
0x1a48   :  { %v2062_v18 = vpop.f32.mrf.mxu0 }
0x1a49   :  { %v2063_v19 = vadd.f32 %v4638_v21, %v2062_v18  ;;  %v4751_v18 = vld [vmem:[%s5024_s2 + $0x60] sm:$0xff] }
0x1a4a   :  { %v3514_v59 = vpop.f32.mrf.mxu0  ;;  %2221 = vmatpush1.msra.mxu0 %v4751_v18 }
0x1a4b   :  { %3697 = vtanh.f32 %v2063_v19  ;;  %v3081_v30 = vmul.f32 -1.442695, %v2063_v19  ;;  %v4757_v19 = vld [vmem:[%s5024_s2 + $0x58] sm:$0xff]  ;;  %v4763_v59 = vld [vmem:[%s5024_s2 + $0x50] sm:$0xff] }
0x1a4c   :  { %2222 = vmatprep.subr.mxu0 %v4757_v19 }
0x1a4d   :  { %3699 = vpow2.f32 %v3081_v30  ;;  %v4775_v30 = vld [vmem:[%s5024_s2 + $0x40] sm:$0xff]  ;;  %2223 = vmatpush1.msra.mxu0 %v4763_v59 }
0x1a58   :  { %v3698_v23 = vpop.eup %3697 }
0x1a59   :  { %2075 = vrot.lane.b32.xlu0 %v3698_v23, %s3756_s24  ;;  %v4769_v23 = vld [vmem:[%s5024_s2 + $0x48] sm:$0xff] }
0x1a5a   :  { %v3700_v24 = vpop.eup %3699  ;;  %2224 = vmatprep.subr.mxu0 %v4769_v23 }
0x1a5b   :  { %v2069_v26 = vadd.f32 1.0, %v3700_v24  ;;  %v4781_v24 = vld [vmem:[%s5024_s2 + $0x38] sm:$0xff]  ;;  %2225 = vmatpush1.msra.mxu0 %v4775_v30 }
0x1a5c   :  { %2226 = vmatprep.subr.mxu0 %v4781_v24 }
0x1a5d   :  { %3701 = vrcp.f32 %v2069_v26  ;;  %v4787_v26 = vld [vmem:[%s5024_s2 + $0x30] sm:$0xff] }
0x1a5e   :  { %2227 = vmatpush1.msra.mxu0 %v4787_v26 }
0x1a6a   :  { %v3702_v13 = vpop.eup %3701 }
0x1a6b   :  { %v2073_v43 = vmul.f32 %v3702_v13, %v4451_v58  ;;  %v4662_v58 = vld [vmem:[%s5021_s1 + $0x8] sm:$0xff] }
0x1a6c   :  { %3520 = vmatpush3.msra.mxu1 %v4662_v58 }
0x1a6d   :  { %3521 = vmatprep.subr.mxu1 %v5041_v37 }
0x1a6e   :  { %3522 = vmatpush3.msra.mxu1 %v4669_v62 }
0x1a6f   :  { %3526 = vmatprep.subr.mxu1 %v5041_v37 }
0x1acb   :  { %v2076_v29 = vpop.permute.xlu0 %2075 }
0x1acc   :  { %v2078_v28 = vmul.f32 %v3702_v13, %v2076_v29  ;;  %v4799_v29 = vld [vmem:[%s5024_s2 + $0x20] sm:$0xff] }
0x1ace   :  { %2080 = vrot.lane.b32.xlu1 %v2078_v28, %s3755_s18  ;;  %v4805_v28 = vld [vmem:[%s5024_s2 + $0x18] sm:$0xff] }
0x1b40   :  { %v2081_v61 = vpop.permute.xlu1 %2080 }
0x1b41   :  { %v4644_v60 = vadd.f32 %v2081_v61, %v2073_v43  ;;  %v4811_v43 = vld [vmem:[%s5024_s2 + $0x10] sm:$0xff]  ;;  %v4817_v61 = vld [vmem:[%s5024_s2 + $0x8] sm:$0xff] }
0x1b43   :  { %3703 = vtanh.f32 %v4644_v60 }
0x1b50   :  { %v3704_v63 = vpop.eup %3703 }
0x1b51   :  { %2086 = vrot.lane.b32.xlu0 %v3704_v63, %s3756_s24  ;;  %v4823_v63 = vld [vmem:[%s5024_s2] sm:$0xff] }
0x1bc3   :  { %v2087_v16 = vpop.permute.xlu0 %2086 }
0x1bc4   :  { %v4676_v31 = vmul.f32 %v3702_v13, %v2087_v16  ;;  %v4793_v13 = vld [vmem:[%s5024_s2 + $0x28] sm:$0xff] }
0x1bc5   :  { %2228 = vmatprep.subr.mxu0 %v4793_v13 }
0x1bc6   :  { %2096 = vrot.lane.b32.xlu1 %v4676_v31, %s3755_s18  ;;  %2229 = vmatpush1.msra.mxu0 %v4799_v29 }
0x1bc7   :  { %2230 = vmatprep.subr.mxu0 %v4805_v28 }
0x1bc8   :  { %2231 = vmatpush1.msra.mxu0 %v4811_v43 }
0x1bc9   :  { %2232 = vmatprep.subr.mxu0 %v4817_v61 }
0x1bca   :  { %2233 = vmatpush1.msra.mxu0 %v4823_v63 }
0x1bcb   :  { %3548 = vmatprep.subr.mxu0 %v5041_v37 }
0x1c38   :  { %v2097_v33 = vpop.permute.xlu1 %2096 }
0x1c39   :  { %3524 = vmatmul.mubr.msk.f32.vlgmr.msra.gmra.mxu1 %vm66_vm1, %v2097_v33 }
0x1c3a   :  { %3527 = vmatpush3.msra.mxu1 %v4683_v32  ;;  %3534 = vmatprep.mubr.msk.f32.mxu1 %vm3754_vm0, %v5041_v37 }
0x1c3b   :  { %3528 = vmatprep.subr.mxu1 %v5041_v37 }
0x1c3c   :  { %3529 = vmatpush3.msra.mxu1 %v4689_v35 }
0x1c3d   :  { %3530 = vmatprep.subr.mxu1 %v5041_v37 }
0x1c3e   :  { %3531 = vmatpush3.msra.mxu1 %v4698_v36 }
0x1c3f   :  { %3532 = vmatprep.subr.mxu1 %v5041_v37 }
0x1c40   :  { %3533 = vmatpush3.msra.mxu1 %v4705_v0 }
0x1c41   :  { %3535 = vmatmul.mubr.msk.f32.vlgmr.msra.gmra.mxu1 %vm66_vm1, %v2097_v33  ;;  %3537 = vmatprep.subr.mxu1 %v5041_v37 }
0x1c42   :  { %3545 = vmatprep.mubr.msk.f32.mxu1 %vm3754_vm0, %v5041_v37 }
0x1cf9   :  { %v2166_v40 = vpop.f32.mrf.mxu1 }
0x1cfa   :  { %v2167_v27 = vadd.f32 %v2166_v40, %v4717_v5 }
0x1cfb   :  { %v3525_v42 = vpop.f32.mrf.mxu1 }
0x1cfc   :  { %v2170_v11 = vsel %vm76_vm2, %v2167_v27, -inf }
0x1cfd   :  { %2171 = vmax.xlane.f32.xlu0 %v2170_v11 }
0x1d01   :  { %v4721_v12 = vpop.f32.mrf.mxu1 }
0x1d03   :  { %v3536_v25 = vpop.f32.mrf.mxu1 }
0x1d13   :  { %2446 = vrot.lane.b32.xlu0 %v4628_v41, %s3756_s24 }
0x1d86   :  { %v2172_v45 = vpop.xlane.xlu0 %2171 }
0x1d87   :  { %v2173_v46 = vsub.f32 %v2167_v27, %v2172_v45 }
0x1d89   :  { %v2174_v48 = vmul.f32 1.442695, %v2173_v46 }
0x1d8b   :  { %3705 = vpow2.f32 %v2174_v48 }
0x1d98   :  { %v3706_v47 = vpop.eup %3705 }
0x1d99   :  { %v2177_v22 = vmul.f32 %v3706_v47, %v4734_v55 }
0x1d9b   :  { %v2178_v41 = vsel %vm76_vm2, %v2177_v22, 0.0 }
0x1d9c   :  { %2179 = vadd.xlane.f32.xlu1 %v2178_v41 }
0x1e25   :  { %v2180_v16 = vpop.xlane.xlu1 %2179 }
0x1e26   :  { %3707 = vrcp.f32 %v2180_v16 }
0x1e33   :  { %v3708_v33 = vpop.eup %3707 }
0x1e34   :  { %v2182_v40 = vmul.f32 %v3708_v33, %v2177_v22 }
0x1e36   :  { %3083 = vmatmul.mubr.msk.f32.vlgmr.msra.gmra.mxu0 %vm76_vm2, %v2182_v40 }
0x1e37   :  { %3549 = vmatpush3.msra.mxu0 %v4490_v3  ;;  %3564 = vmatprep.mubr.msk.f32.mxu0 %vm3754_vm0, %v5041_v37  ;;  %v3087_v3 = vld [vmem:[%s5014_s0 + $0x20] sm:$0xff] }
0x1e38   :  { %3550 = vmatprep.subr.mxu0 %v5041_v37 }
0x1e39   :  { %3551 = vmatpush3.msra.mxu0 %v4496_v4  ;;  %v2447_v4 = vpop.permute.xlu0 %2446 }
0x1e3a   :  { %3552 = vmatprep.subr.mxu0 %v5041_v37 }
0x1e3b   :  { %3553 = vmatpush3.msra.mxu0 %v4505_v39  ;;  %v2449_v39 = vsel %vm66_vm1, %v3087_v3, %v2447_v4 }
0x1e3c   :  { %3554 = vmatprep.subr.mxu0 %v5041_v37 }
0x1e3d   :  { %3555 = vmatpush3.msra.mxu0 %v4512_v6  ;;  %v4866_v6 = vld [vmem:[%s5026_s15 + $0x18] sm:$0xff] }
0x1e3e   :  { %3556 = vmatprep.subr.mxu0 %v5041_v37  ;;  %3538 = vmatpush3.msra.mxu1 %v4866_v6 }
0x1e3f   :  { %3557 = vmatpush3.msra.mxu0 %v4519_v7  ;;  %v4871_v7 = vld [vmem:[%s5026_s15 + $0x10] sm:$0xff]  ;;  %3539 = vmatprep.subr.mxu1 %v5041_v37 }
0x1e40   :  { %3558 = vmatprep.subr.mxu0 %v5041_v37  ;;  %3540 = vmatpush3.msra.mxu1 %v4871_v7 }
0x1e41   :  { %3559 = vmatpush3.msra.mxu0 %v4526_v8  ;;  %3541 = vmatprep.subr.mxu1 %v5041_v37  ;;  %v4880_v8 = vld [vmem:[%s5026_s15 + $0x8] sm:$0xff] }
0x1e42   :  { %3560 = vmatprep.subr.mxu0 %v5041_v37  ;;  %3542 = vmatpush3.msra.mxu1 %v4880_v8 }
0x1e43   :  { %3561 = vmatpush3.msra.mxu0 %v4533_v9  ;;  %3543 = vmatprep.subr.mxu1 %v5041_v37  ;;  %v4887_v9 = vld [vmem:[%s5026_s15] sm:$0xff] }
0x1e44   :  { %3562 = vmatprep.subr.mxu0 %v5041_v37  ;;  %3544 = vmatpush3.msra.mxu1 %v4887_v9 }
0x1e45   :  { %3563 = vmatpush3.msra.mxu0 %v4543_v20  ;;  %3567 = vmatprep.subr.mxu1 %v5041_v37 }
0x1e46   :  { %3565 = vmatmul.mubr.msk.f32.vlgmr.msra.gmra.mxu0 %vm76_vm2, %v2449_v39  ;;  %3586 = vmatprep.subr.mxu0 %v5041_v37 }
0x1e47   :  { %3587 = vmatpush3.msra.mxu0 %v4650_v2  ;;  %3594 = vmatprep.mubr.msk.f32.mxu0 %vm3754_vm0, %v5041_v37 }
0x1e48   :  { %3588 = vmatprep.subr.mxu0 %v5041_v37 }
0x1e49   :  { %3589 = vmatpush3.msra.mxu0 %v4655_v10 }
0x1e4a   :  { %3590 = vmatprep.subr.mxu0 %v5041_v37 }
0x1e4b   :  { %3591 = vmatpush3.msra.mxu0 %v4662_v58 }
0x1e4c   :  { %3592 = vmatprep.subr.mxu0 %v5041_v37 }
0x1e4d   :  { %3593 = vmatpush3.msra.mxu0 %v4669_v62 }
0x1e4e   :  { %3597 = vmatprep.subr.mxu0 %v5041_v37 }
0x1ef6   :  { %v2268_v20 = vpop.f32.mrf.mxu0 }
0x1ef8   :  { %v2270_v2 = vpop.f32.mrf.mxu0 }
0x1ef9   :  { %v2344_v10 = vadd.f32 %v4721_v12, %v2270_v2 }
0x1efb   :  { %3709 = vtanh.f32 %v2344_v10 }
0x1f06   :  { %v2527_v58 = vpop.f32.mrf.mxu0 }
0x1f07   :  { %v2528_v62 = vadd.f32 %v2527_v58, %v2268_v20 }
0x1f08   :  { %v3710_v27 = vpop.eup %3709  ;;  %v3566_v42 = vpop.f32.mrf.mxu0 }
0x1f09   :  { %v2538_v11 = vadd.f32 %v4556_v34, %v2528_v62  ;;  %3546 = vmatmul.mubr.msk.f32.vlgmr.msra.gmra.mxu1 %vm66_vm1, %v3710_v27 }
0x1f0a   :  { %3568 = vmatpush3.msra.mxu1 %v4573_v50  ;;  %3583 = vmatprep.mubr.msk.f32.mxu1 %vm3754_vm0, %v5041_v37 }
0x1f0b   :  { %3711 = vtanh.f32 %v2538_v11  ;;  %3569 = vmatprep.subr.mxu1 %v5041_v37  ;;  %v3090_v50 = vmul.f32 -1.442695, %v2538_v11 }
0x1f0c   :  { %3570 = vmatpush3.msra.mxu1 %v4578_v51 }
0x1f0d   :  { %3571 = vmatprep.subr.mxu1 %v5041_v37  ;;  %3713 = vpow2.f32 %v3090_v50 }
0x1f0e   :  { %3572 = vmatpush3.msra.mxu1 %v4585_v15 }
0x1f0f   :  { %3573 = vmatprep.subr.mxu1 %v5041_v37 }
0x1f10   :  { %3574 = vmatpush3.msra.mxu1 %v4592_v52 }
0x1f11   :  { %3575 = vmatprep.subr.mxu1 %v5041_v37 }
0x1f12   :  { %3576 = vmatpush3.msra.mxu1 %v4599_v53 }
0x1f13   :  { %3577 = vmatprep.subr.mxu1 %v5041_v37 }
0x1f14   :  { %3578 = vmatpush3.msra.mxu1 %v4606_v54 }
0x1f15   :  { %3579 = vmatprep.subr.mxu1 %v5041_v37 }
0x1f16   :  { %3580 = vmatpush3.msra.mxu1 %v4614_v56 }
0x1f17   :  { %3581 = vmatprep.subr.mxu1 %v5041_v37 }
0x1f18   :  { %v3712_v34 = vpop.eup %3711  ;;  %3582 = vmatpush3.msra.mxu1 %v4625_v57 }
0x1f19   :  { %2548 = vrot.lane.b32.xlu1 %v3712_v34, %s3756_s24  ;;  %2811 = vmatprep.subr.mxu1 %v4728_v1 }
0x1f1a   :  { %v3714_v51 = vpop.eup %3713 }
0x1f1b   :  { %v2542_v15 = vadd.f32 1.0, %v3714_v51 }
0x1f1d   :  { %3715 = vrcp.f32 %v2542_v15 }
0x1f2a   :  { %v3716_v52 = vpop.eup %3715 }
0x1f2b   :  { %v2546_v25 = vmul.f32 %v3716_v52, %v4567_v49 }
0x1f8b   :  { %v2549_v53 = vpop.permute.xlu1 %2548 }
0x1f8c   :  { %v2551_v54 = vmul.f32 %v3716_v52, %v2549_v53 }
0x1f8e   :  { %2553 = vrot.lane.b32.xlu0 %v2551_v54, %s3755_s18 }
0x1fc9   :  { %v4914_v56 = vpop.f32.mrf.mxu1 }
0x1fcb   :  { %v3547_v12 = vpop.f32.mrf.mxu1 }
0x2000   :  { %v2554_v57 = vpop.permute.xlu0 %2553 }
0x2001   :  { %v2556_v45 = vadd.f32 %v2554_v57, %v2546_v25 }
0x2003   :  { %3717 = vtanh.f32 %v2556_v45 }
0x2010   :  { %v3718_v46 = vpop.eup %3717 }
0x2011   :  { %2559 = vrot.lane.b32.xlu1 %v3718_v46, %s3756_s24 }
0x2015   :  { %2567 = vrot.lane.b32.xlu1 %v4676_v31, %s3756_s24 }
0x2083   :  { %v2560_v1 = vpop.permute.xlu1 %2559 }
0x2084   :  { %v2562_v48 = vmul.f32 %v3716_v52, %v2560_v1 }
0x2086   :  { %2564 = vrot.lane.b32.xlu0 %v2562_v48, %s3755_s18 }
0x2087   :  { %v2568_v47 = vpop.permute.xlu1 %2567 }
0x20f8   :  { %v2565_v22 = vpop.permute.xlu0 %2564 }
0x20f9   :  { %v2570_v41 = vsel %vm66_vm1, %v2565_v22, %v2568_v47 }
0x20fa   :  { %3584 = vmatmul.mubr.msk.f32.vlgmr.msra.gmra.mxu1 %vm76_vm2, %v2570_v41 }
0x20fb   :  { %2812 = vmatpush1.msra.mxu1 %v4741_v14  ;;  %2859 = vmatprep.mubr.f32.mxu1 %v5041_v37 }
0x20fc   :  { %2813 = vmatprep.subr.mxu1 %v4746_v17 }
0x20fd   :  { %2814 = vmatpush1.msra.mxu1 %v4751_v18 }
0x20fe   :  { %2815 = vmatprep.subr.mxu1 %v4757_v19 }
0x20ff   :  { %2816 = vmatpush1.msra.mxu1 %v4763_v59 }
0x2100   :  { %2817 = vmatprep.subr.mxu1 %v4769_v23 }
0x2101   :  { %2818 = vmatpush1.msra.mxu1 %v4775_v30 }
0x2102   :  { %2819 = vmatprep.subr.mxu1 %v4781_v24 }
0x2103   :  { %2820 = vmatpush1.msra.mxu1 %v4787_v26 }
0x2104   :  { %2821 = vmatprep.subr.mxu1 %v4793_v13 }
0x2105   :  { %2822 = vmatpush1.msra.mxu1 %v4799_v29 }
0x2106   :  { %2823 = vmatprep.subr.mxu1 %v4805_v28 }
0x2107   :  { %2824 = vmatpush1.msra.mxu1 %v4811_v43 }
0x2108   :  { %2825 = vmatprep.subr.mxu1 %v4817_v61 }
0x2109   :  { %2826 = vmatpush1.msra.mxu1 %v4823_v63  ;;  %v5044_v63 = vld [vmem:[#allocation4_spill] sm:$0xff] }
0x21ba   :  { %v2655_v49 = vpop.f32.mrf.mxu1 }
0x21bb   :  { %v2656_v31 = vadd.f32 %v4638_v21, %v2655_v49 }
0x21bc   :  { %v3585_v14 = vpop.f32.mrf.mxu1 }
0x21bd   :  { %3719 = vtanh.f32 %v2656_v31  ;;  %v3093_v18 = vmul.f32 -1.442695, %v2656_v31 }
0x21bf   :  { %3721 = vpow2.f32 %v3093_v18 }
0x21ca   :  { %v3720_v17 = vpop.eup %3719 }
0x21cb   :  { %2668 = vrot.lane.b32.xlu0 %v3720_v17, %s3756_s24 }
0x21cc   :  { %v3722_v19 = vpop.eup %3721 }
0x21cd   :  { %v2662_v59 = vadd.f32 1.0, %v3722_v19 }
0x21cf   :  { %3723 = vrcp.f32 %v2662_v59 }
0x21dc   :  { %v3724_v23 = vpop.eup %3723 }
0x21dd   :  { %v2666_v26 = vmul.f32 %v3724_v23, %v4644_v60 }
0x223d   :  { %v2669_v30 = vpop.permute.xlu0 %2668 }
0x223e   :  { %v2671_v24 = vmul.f32 %v3724_v23, %v2669_v30 }
0x2240   :  { %2673 = vrot.lane.b32.xlu1 %v2671_v24, %s3755_s18 }
0x22b2   :  { %v2674_v13 = vpop.permute.xlu1 %2673 }
0x22b3   :  { %v2676_v29 = vadd.f32 %v2674_v13, %v2666_v26 }
0x22b5   :  { %3725 = vtanh.f32 %v2676_v29 }
0x22c2   :  { %v3726_v21 = vpop.eup %3725 }
0x22c3   :  { %2679 = vrot.lane.b32.xlu0 %v3726_v21, %s3756_s24 }
0x2335   :  { %v2680_v28 = vpop.permute.xlu0 %2679 }
0x2336   :  { %v2682_v43 = vmul.f32 %v3724_v23, %v2680_v28 }
0x2338   :  { %2689 = vrot.lane.b32.xlu1 %v2682_v43, %s3755_s18 }
0x23aa   :  { %v2690_v61 = vpop.permute.xlu1 %2689 }
0x23ab   :  { %3595 = vmatmul.mubr.msk.f32.vlgmr.msra.gmra.mxu0 %vm66_vm1, %v2690_v61 }
0x23ac   :  { %3598 = vmatpush3.msra.mxu0 %v4683_v32  ;;  %3605 = vmatprep.mubr.msk.f32.mxu0 %vm3754_vm0, %v5041_v37 }
0x23ad   :  { %3599 = vmatprep.subr.mxu0 %v5041_v37 }
0x23ae   :  { %3600 = vmatpush3.msra.mxu0 %v4689_v35 }
0x23af   :  { %3601 = vmatprep.subr.mxu0 %v5041_v37 }
0x23b0   :  { %3602 = vmatpush3.msra.mxu0 %v4698_v36  ;;  %v3049_v36 = vld [vmem:[%s5027_s16] ss:$0 sm:$0xff] }
0x23b1   :  { %3603 = vmatprep.subr.mxu0 %v5041_v37  ;;  %v650_v16 = vadd.f32 %v3049_v36, %v5044_v63  ;;  %v4973_v40 = vadd.f32 %v3049_v36, %v4415_v38  ;;  %v1836_v58 = vadd.f32 %v3049_v36, %v4564_v44 }
0x23b2   :  { %3604 = vmatpush3.msra.mxu0 %v4705_v0 }
0x23b3   :  { %3606 = vmatmul.mubr.msk.f32.vlgmr.msra.gmra.mxu0 %vm66_vm1, %v2690_v61  ;;  %3608 = vmatprep.subr.mxu0 %v5041_v37 }
0x23b4   :  { %3609 = vmatpush3.msra.mxu0 %v4866_v6  ;;  %3616 = vmatprep.mubr.msk.f32.mxu0 %vm3754_vm0, %v5041_v37 }
0x23b5   :  { %3610 = vmatprep.subr.mxu0 %v5041_v37 }
0x23b6   :  { %3611 = vmatpush3.msra.mxu0 %v4871_v7 }
0x23b7   :  { %3612 = vmatprep.subr.mxu0 %v5041_v37 }
0x23b8   :  { %3613 = vmatpush3.msra.mxu0 %v4880_v8 }
0x23b9   :  { %3614 = vmatprep.subr.mxu0 %v5041_v37 }
0x23ba   :  { %3615 = vmatpush3.msra.mxu0 %v4887_v9 }
0x246b   :  { %v2759_v60 = vpop.f32.mrf.mxu0 }
0x246c   :  { %v2760_v32 = vadd.f32 %v2759_v60, %v4717_v5  ;;  %v3085_v5 = vld [vmem:[%s5027_s16] ss:$0 sm:$0xff] }
0x246d   :  { %v3596_v35 = vpop.f32.mrf.mxu0  ;;  %v4980_v3 = vadd.f32 %v3085_v5, %v4914_v56 }
0x246e   :  { %v2763_v0 = vsel %vm76_vm2, %v2760_v32, -inf }
0x246f   :  { %2764 = vmax.xlane.f32.xlu0 %v2763_v0 }
0x2473   :  { %v2935_v33 = vpop.f32.mrf.mxu0  ;;  %653 = vmax.xlane.f32.xlu0 %v650_v16 }
0x2475   :  { %v3607_v37 = vpop.f32.mrf.mxu0 }
0x2477   :  { %1246 = vmax.xlane.f32.xlu0 %v4973_v40 }
0x247b   :  { %2432 = vmax.xlane.f32.xlu0 %v4980_v3 }
0x24f8   :  { %v2765_v4 = vpop.xlane.xlu0 %2764 }
0x24f9   :  { %v2766_v39 = vsub.f32 %v2760_v32, %v2765_v4 }
0x24fb   :  { %v2767_v6 = vmul.f32 1.442695, %v2766_v39 }
0x24fc   :  { %v654_v7 = vpop.xlane.xlu0 %653 }
0x24fd   :  { %3727 = vpow2.f32 %v2767_v6  ;;  %v655_v8 = vsub.f32 %v650_v16, %v654_v7 }
0x24ff   :  { %v656_v38 = vmul.f32 1.442695, %v655_v8 }
0x2500   :  { %v1247_v62 = vpop.xlane.xlu0 %1246 }
0x2501   :  { %3729 = vpow2.f32 %v656_v38  ;;  %v1248_v41 = vsub.f32 %v4973_v40, %v1247_v62 }
0x2503   :  { %v1249_v49 = vmul.f32 1.442695, %v1248_v41 }
0x2504   :  { %v4986_v27 = vpop.xlane.xlu0 %2432 }
0x2505   :  { %v2434_v31 = vsub.f32 %v4980_v3, %v4986_v27 }
0x2507   :  { %v2435_v14 = vmul.f32 1.442695, %v2434_v31 }
0x250a   :  { %v3728_v9 = vpop.eup %3727 }
0x250b   :  { %v2770_v20 = vmul.f32 %v3728_v9, %v4734_v55 }
0x250d   :  { %v2771_v2 = vsel %vm76_vm2, %v2770_v20, 0.0 }
0x250e   :  { %v3730_v10 = vpop.eup %3729  ;;  %2772 = vadd.xlane.f32.xlu1 %v2771_v2 }
0x250f   :  { %658 = vadd.xlane.f32.xlu0 %v3730_v10 }
0x2512   :  { %1839 = vmax.xlane.f32.xlu1 %v1836_v58 }
0x2597   :  { %v2773_v42 = vpop.xlane.xlu1 %2772 }
0x2598   :  { %3731 = vrcp.f32 %v2773_v42  ;;  %v659_v11 = vpop.xlane.xlu0 %658 }
0x2599   :  { %3733 = vlog2.f32 %v659_v11 }
0x259b   :  { %v1840_v34 = vpop.xlane.xlu1 %1839 }
0x259c   :  { %v1841_v50 = vsub.f32 %v1836_v58, %v1840_v34 }
0x259e   :  { %v1842_v51 = vmul.f32 1.442695, %v1841_v50 }
0x25a0   :  { %3735 = vpow2.f32 %v1842_v51 }
0x25a5   :  { %v3732_v55 = vpop.eup %3731 }
0x25a6   :  { %v3734_v15 = vpop.eup %3733  ;;  %v2775_v52 = vmul.f32 %v3732_v55, %v2770_v20 }
0x25a7   :  { %v661_v53 = vmul.f32 0.6931472, %v3734_v15 }
0x25a8   :  { %3095 = vmatmul.mubr.msk.f32.vlgmr.msra.gmra.mxu1 %vm76_vm2, %v2775_v52 }
0x25a9   :  { %v662_v54 = vadd.f32 %v661_v53, %v654_v7 }
0x25ab   :  { %v663_v44 = vsub.f32 %v650_v16, %v662_v54 }
0x25ad   :  { %v3736_v56 = vpop.eup %3735  ;;  %664 = vst [vmem:[%s5028_s17] sm:$0xff] %v663_v44 }
0x25ae   :  { %1844 = vadd.xlane.f32.xlu0 %v3736_v56 }
0x2637   :  { %v1845_v12 = vpop.xlane.xlu0 %1844 }
0x2638   :  { %3737 = vlog2.f32 %v1845_v12 }
0x2645   :  { %v3738_v25 = vpop.eup %3737 }
0x2646   :  { %v1847_v57 = vmul.f32 0.6931472, %v3738_v25 }
0x2648   :  { %v1848_v45 = vadd.f32 %v1847_v57, %v1840_v34 }
0x264a   :  { %v1849_v46 = vsub.f32 %v1836_v58, %v1848_v45 }
0x264c   :  { %1850 = vst [vmem:[%s5028_s17 + $0x10] sm:$0xff] %v1849_v46 }
0x2668   :  { %v2861_v1 = vpop.f32.mrf.mxu1 }
0x266a   :  { %v2862_v48 = vpop.f32.mrf.mxu1 }
0x266b   :  { %v2936_v47 = vadd.f32 %v2935_v33, %v2862_v48 }
0x266d   :  { %3739 = vtanh.f32 %v2936_v47 }
0x266e   :  { %3741 = vpow2.f32 %v1249_v49 }
0x266f   :  { %3743 = vpow2.f32 %v2435_v14 }
0x267a   :  { %v3740_v22 = vpop.eup %3739 }
0x267b   :  { %3617 = vmatmul.mubr.msk.f32.vlgmr.msra.gmra.mxu0 %vm66_vm1, %v3740_v22  ;;  %v3742_v59 = vpop.eup %3741 }
0x267c   :  { %v3744_v23 = vpop.eup %3743 }
0x273b   :  { %v3020_v17 = vpop.f32.mrf.mxu0 }
0x273c   :  { %v3021_v18 = vadd.f32 %v3085_v5, %v3020_v17 }
0x273d   :  { %v3618_v19 = vpop.f32.mrf.mxu0 }
0x273e   :  { %3024 = vmax.xlane.f32.xlu1 %v3021_v18 }
0x2742   :  { %1251 = vadd.xlane.f32.xlu1 %v3742_v59 }
0x2746   :  { %2437 = vadd.xlane.f32.xlu1 %v3744_v23 }
0x27c7   :  { %v3025_v30 = vpop.xlane.xlu1 %3024 }
0x27c8   :  { %v3026_v24 = vsub.f32 %v3021_v18, %v3025_v30 }
0x27ca   :  { %v3027_v26 = vmul.f32 1.442695, %v3026_v24 }
0x27cb   :  { %v1252_v13 = vpop.xlane.xlu1 %1251 }
0x27cc   :  { %3745 = vpow2.f32 %v3027_v26 }
0x27cd   :  { %3747 = vlog2.f32 %v1252_v13 }
0x27cf   :  { %v2438_v29 = vpop.xlane.xlu1 %2437 }
0x27d0   :  { %3749 = vlog2.f32 %v2438_v29 }
0x27d9   :  { %v3746_v21 = vpop.eup %3745 }
0x27da   :  { %v3748_v28 = vpop.eup %3747  ;;  %3029 = vadd.xlane.f32.xlu0 %v3746_v21 }
0x27db   :  { %v1254_v43 = vmul.f32 0.6931472, %v3748_v28 }
0x27dd   :  { %v3750_v61 = vpop.eup %3749  ;;  %v1255_v60 = vadd.f32 %v1254_v43, %v1247_v62 }
0x27de   :  { %v2440_v32 = vmul.f32 0.6931472, %v3750_v61 }
0x27df   :  { %v1256_v35 = vsub.f32 %v4973_v40, %v1255_v60 }
0x27e0   :  { %v2441_v36 = vadd.f32 %v2440_v32, %v4986_v27 }
0x27e1   :  { %1257 = vst [vmem:[%s5028_s17 + $0x8] sm:$0xff] %v1256_v35 }
0x27e2   :  { %v2442_v0 = vsub.f32 %v4980_v3, %v2441_v36 }
0x27e4   :  { %2443 = vst [vmem:[%s5028_s17 + $0x18] sm:$0xff] %v2442_v0 }
0x2863   :  { %v3030_v63 = vpop.xlane.xlu0 %3029 }
0x2864   :  { %3751 = vlog2.f32 %v3030_v63 }
0x2871   :  { %v3752_v16 = vpop.eup %3751 }
0x2872   :  { %v3032_v33 = vmul.f32 0.6931472, %v3752_v16 }
0x2874   :  { %v3033_v37 = vadd.f32 %v3032_v33, %v3025_v30 }
0x2876   :  { %v3034_v5 = vsub.f32 %v3021_v18, %v3033_v37 }
0x2878   :  { %3035 = vst [vmem:[%s5028_s17 + $0x20] sm:$0xff] %v3034_v5 }

</bundles_post_ra>
